<compile_context>
chip_gen: v7x
topology: tpu7x:2x2x1
jax: 0.10.0
libtpu: 0.0.40
codegen_flags: <defaults>
</compile_context>

<pallas_src>
import functools

import jax
import jax.numpy as jnp
from jax.experimental import pallas as pl
from jax.experimental.pallas import tpu as pltpu

EPS = 1e-5  # BatchNorm eps
VMEM_LIMIT = 64 * 1024 * 1024  # raised scoped-VMEM limit, still <= v7x physical


def _largest_divisor_le(n, k):
    for d in range(min(n, k), 0, -1):
        if n % d == 0:
            return d
    return 1


# --------------------------------------------------------------------------
# One-time (weight-load-time) parameter preparation — hoisted out of the
# jitted forward: eval-BN folding, branch fusion, row permutation, bf16 casts.
# --------------------------------------------------------------------------
def fold_bn(w, b, g, bt, rm, rv):
    """Fold eval-mode BatchNorm into the preceding linear/conv weight+bias."""
    scale = g * jax.lax.rsqrt(rv + EPS)
    return w * scale, (b - rm) * scale + bt


def prepare_params(ap, fcp, pool):
    BR, C, K1 = ap["w1"].shape
    w1f, b1f = fold_bn(ap["w1"], ap["b1"], ap["g1"], ap["bt1"],
                       ap["rm1"], ap["rv1"])                 # [BR,C,K1],[BR,1,K1]
    w2f, b2f = fold_bn(ap["w2"], ap["b2"], ap["g2"], ap["bt2"],
                       ap["rm2"], ap["rv2"])                 # [BR,K1,1],[BR,1,1]
    w1_t = jnp.transpose(w1f, (0, 2, 1)).reshape(BR * K1, C)   # fused conv1
    b1_col = b1f.reshape(BR * K1, 1)
    # Block-diagonal conv2 weight (all branches in one MXU dot); redundant
    # FLOPs are negligible at small BR.  Built once here, not per call.
    # TODO(synk): for BR >= 8 switch to a per-branch batched contraction.
    w2_blk = jnp.zeros((BR, BR * K1), jnp.float32)
    for r in range(BR):
        w2_blk = w2_blk.at[r, r * K1:(r + 1) * K1].set(w2f[r, :, 0])
    b2_col = b2f.reshape(BR, 1)
    attn = dict(w1=w1_t.astype(jnp.bfloat16), b1=b1_col,
                w2=w2_blk.astype(jnp.bfloat16), b2=b2_col)

    layers, relu = [], []
    if pool == "concat":
        wf1, bf1 = fold_bn(fcp["w_fc1"], fcp["b_fc1"], fcp["g_fc1"],
                           fcp["bt_fc1"], fcp["rm_fc1"], fcp["rv_fc1"])
        # feat arrives channel-major ([B, C*BR], flat index c*BR + r); permute
        # fc1's rows once so no feat transpose is ever needed at run time.
        wf1 = wf1.reshape(BR, C, C).transpose(1, 0, 2).reshape(C * BR, C)
        layers.append((wf1.astype(jnp.bfloat16), bf1))
        relu.append(True)
    wf2, bf2 = fold_bn(fcp["w_fc2"], fcp["b_fc2"], fcp["g_fc2"],
                       fcp["bt_fc2"], fcp["rm_fc2"], fcp["rv_fc2"])
    layers.append((wf2.astype(jnp.bfloat16), bf2))
    relu.append(True)
    layers.append((fcp["w_out"].astype(jnp.bfloat16), fcp["b_out"]))
    relu.append(False)
    return attn, layers, tuple(relu)


# --------------------------------------------------------------------------
# Fused attention-branches kernel. Per grid step: b_blk images x one HW tile.
#   h    = relu([BR*K1, C]bf16 @ [C, HWt]bf16 + b1)          (conv1+BN folded)
#   mask = sigmoid([BR, BR*K1]bf16(block-diag) @ h_bf16 + b2) (conv2+BN folded)
#   feat += x_bf16 @ (mask+1)^T_bf16  -> [C, BR]   (only the small mask is
#                                                   transposed, never x)
# feat is accumulated in the resident output block over the HW grid axis and
# scaled by 1/HW at the last HW step.
# --------------------------------------------------------------------------
def attention_kernel(x_ref, w1_ref, b1_ref, w2_ref, b2_ref, mask_ref, feat_ref,
                     *, b_blk, inv_hw):
    ihw = pl.program_id(1)

    @pl.when(ihw == 0)
    def _():
        feat_ref[...] = jnp.zeros_like(feat_ref)

    w1 = w1_ref[...]        # bf16 [BR*K1, C]
    b1 = b1_ref[...]        # f32  [BR*K1, 1]
    w2 = w2_ref[...]        # bf16 [BR, BR*K1]
    b2 = b2_ref[...]        # f32  [BR, 1]

    for i in range(b_blk):                                   # static unroll
        x = x_ref[i]                                         # f32 [C, HWt]
        x_bf = x.astype(jnp.bfloat16)
        # conv1 (all branches fused) -> ReLU : [BR*K1, HWt], f32 accumulate
        h = jnp.dot(w1, x_bf, preferred_element_type=jnp.float32) + b1
        h = jnp.maximum(h, 0.0)
        # conv2 (block-diag across branches) -> sigmoid : [BR, HWt]
        m = jnp.dot(w2, h.astype(jnp.bfloat16),
                    preferred_element_type=jnp.float32) + b2
        m = jax.nn.sigmoid(m)
        mask_ref[i] = m                                      # lane-dense store
        # feat[i] += x @ (m+1)^T -> [C, BR]; contraction on the lane axis of
        # both operands so only the small [BR, HWt] mask is transposed.
        feat_ref[i] += jax.lax.dot_general(
            x_bf, (m + 1.0).astype(jnp.bfloat16),
            (((1,), (1,)), ((), ())), preferred_element_type=jnp.float32)

    @pl.when(ihw == pl.num_programs(1) - 1)
    def _():
        feat_ref[...] = feat_ref[...] * inv_hw


def attention_branches(x_cm, w1_bf, b1_col, w2_bf, b2_col,
                       *, b_blk=None, hw_blk=None):
    B, C, HW = x_cm.shape
    BRK1 = w1_bf.shape[0]
    BR = w2_bf.shape[0]
    if b_blk is None:
        b_blk = _largest_divisor_le(B, 8)
    if hw_blk is None:
        hw_blk = HW          # biggest tile that fits; set smaller (mult of 128)
                             # on v7x at production C/HW to stay in 64 MiB VMEM
    assert B % b_blk == 0 and HW % hw_blk == 0
    grid = (B // b_blk, HW // hw_blk)
    kern = functools.partial(attention_kernel, b_blk=b_blk, inv_hw=1.0 / HW)
    return pl.pallas_call(
        kern,
        out_shape=(jax.ShapeDtypeStruct((B, BR, HW), jnp.float32),
                   jax.ShapeDtypeStruct((B, C, BR), jnp.float32)),
        grid=grid,
        in_specs=[
            pl.BlockSpec((b_blk, C, hw_blk), lambda ib, ih: (ib, 0, ih)),
            pl.BlockSpec((BRK1, C), lambda ib, ih: (0, 0)),
            pl.BlockSpec((BRK1, 1), lambda ib, ih: (0, 0)),
            pl.BlockSpec((BR, BRK1), lambda ib, ih: (0, 0)),
            pl.BlockSpec((BR, 1), lambda ib, ih: (0, 0)),
        ],
        out_specs=(
            pl.BlockSpec((b_blk, BR, hw_blk), lambda ib, ih: (ib, 0, ih)),
            pl.BlockSpec((b_blk, C, BR), lambda ib, ih: (ib, 0, 0)),
        ),
        compiler_params=pltpu.CompilerParams(
            dimension_semantics=("parallel", "arbitrary"),
            vmem_limit_bytes=VMEM_LIMIT),
    )(x_cm, w1_bf, b1_col, w2_bf, b2_col)


# --------------------------------------------------------------------------
# Fused FC head: feat -> fc1(+ReLU) -> fc2(+ReLU) -> output, BN folded,
# bf16 MXU operands, f32 bias/activation, one pallas_call, chained dots.
# --------------------------------------------------------------------------
def fc_head_kernel(x_ref, *refs, relu_flags):
    h = x_ref[...]                                           # f32
    for l, relu in enumerate(relu_flags):
        w = refs[2 * l][...]                                 # bf16 weight
        b = refs[2 * l + 1][...]                             # f32 bias
        h = jnp.dot(h.astype(jnp.bfloat16), w,
                    preferred_element_type=jnp.float32) + b
        if relu:
            h = jnp.maximum(h, 0.0)
    refs[-1][...] = h


def fc_head(feat, layers, relu_flags):
    B, K = feat.shape
    out_dim = layers[-1][0].shape[1]
    bm = B if B % 8 else min(B, 128)        # row-block; "parallel" for v7x 2 TCs
    grid = (pl.cdiv(B, bm),)
    args = [feat]
    in_specs = [pl.BlockSpec((bm, K), lambda i: (i, 0))]
    for (w, b) in layers:
        args += [w, b]
        in_specs += [pl.BlockSpec(tuple(w.shape), lambda i: (0, 0)),
                     pl.BlockSpec(tuple(b.shape), lambda i: (0, 0))]
    kern = functools.partial(fc_head_kernel, relu_flags=tuple(relu_flags))
    return pl.pallas_call(
        kern,
        out_shape=jax.ShapeDtypeStruct((B, out_dim), jnp.float32),
        grid=grid,
        in_specs=in_specs,
        out_specs=pl.BlockSpec((bm, out_dim), lambda i: (i, 0)),
        compiler_params=pltpu.CompilerParams(
            dimension_semantics=("parallel",),
            vmem_limit_bytes=VMEM_LIMIT),
    )(*args)


# --------------------------------------------------------------------------
# Full forward pass (takes PRE-PACKED parameters from prepare_params)
# --------------------------------------------------------------------------
def multi_branch_attention_forward(x_nchw, attn, fc_layers, relu_flags, pool):
    B, C, H, W = x_nchw.shape
    BR = attn["w2"].shape[0]
    HW = H * W
    x_cm = x_nchw.reshape(B, C, HW)          # channels-major, no transpose

    masks, feats = attention_branches(
        x_cm, attn["w1"], attn["b1"], attn["w2"], attn["b2"])
    # masks: [B, BR, HW] (lane-dense);  feats: [B, C, BR] branch-wise means
    multi_mask = [masks[:, r].reshape(B, 1, H, W) for r in range(BR)]

    if pool == "concat":
        feat = feats.reshape(B, C * BR)      # channel-major; fc1 rows permuted
    elif pool == "addition":
        feat = jnp.sum(feats, axis=2)        # [B, C]
    else:
        raise ValueError("invalid pool option")

    out = fc_head(feat, fc_layers, relu_flags)
    return out, multi_mask


# --------------------------------------------------------------------------
# Deterministic synthetic parameters (shapes from the module __init__)
# --------------------------------------------------------------------------
def init_params(key, input_dim, output_dim, branch_number, pool):
    C, BR = input_dim, branch_number
    ks = jax.random.split(key, 24)

    def xavier(k, shape):
        fan_in, fan_out = shape[-2], shape[-1]
        a = (6.0 / (fan_in + fan_out)) ** 0.5
        return jax.random.uniform(k, shape, jnp.float32, -a, a)

    def bn(k, shape):
        kk = jax.random.split(k, 4)
        return dict(
            g=jax.random.uniform(kk[0], shape, jnp.float32, 0.5, 1.5),
            bt=0.1 * jax.random.normal(kk[1], shape, jnp.float32),
            rm=0.1 * jax.random.normal(kk[2], shape, jnp.float32),
            rv=jax.random.uniform(kk[3], shape, jnp.float32, 0.5, 1.5),
        )

    bn1 = bn(ks[0], (BR, 1, 64))
    bn2 = bn(ks[1], (BR, 1, 1))
    ap = dict(
        w1=xavier(ks[2], (BR, C, 64)),
        b1=0.05 * jax.random.normal(ks[3], (BR, 1, 64), jnp.float32),
        g1=bn1["g"], bt1=bn1["bt"], rm1=bn1["rm"], rv1=bn1["rv"],
        w2=xavier(ks[4], (BR, 64, 1)),
        b2=0.05 * jax.random.normal(ks[5], (BR, 1, 1), jnp.float32),
        g2=bn2["g"], bt2=bn2["bt"], rm2=bn2["rm"], rv2=bn2["rv"],
    )

    fcp = {}
    if pool == "concat":
        b1 = bn(ks[6], (1, C))
        fcp.update(w_fc1=xavier(ks[7], (C * BR, C)),
                   b_fc1=0.05 * jax.random.normal(ks[8], (1, C), jnp.float32),
                   g_fc1=b1["g"], bt_fc1=b1["bt"],
                   rm_fc1=b1["rm"], rv_fc1=b1["rv"])
    b2_ = bn(ks[9], (1, 1024))
    fc2_in = C
    fcp.update(w_fc2=xavier(ks[10], (fc2_in, 1024)),
               b_fc2=0.05 * jax.random.normal(ks[11], (1, 1024), jnp.float32),
               g_fc2=b2_["g"], bt_fc2=b2_["bt"],
               rm_fc2=b2_["rm"], rv_fc2=b2_["rv"])
    fcp.update(
        w_out=jax.nn.initializers.orthogonal()(ks[12], (1024, output_dim),
                                               jnp.float32),
        b_out=0.05 * jax.random.normal(ks[13], (1, output_dim), jnp.float32),
    )
    return ap, fcp


# --------------------------------------------------------------------------
# Pure-JAX f32 reference for verification (unfolded BN, per-branch loop)
# --------------------------------------------------------------------------
def ref_forward(x_nchw, ap, fcp, pool):
    B, C, H, W = x_nchw.shape
    BR = ap["w1"].shape[0]
    xp = jnp.transpose(x_nchw, (0, 2, 3, 1)).reshape(B, H * W, C)

    def bnorm(y, g, bt, rm, rv):
        return (y - rm) / jnp.sqrt(rv + EPS) * g + bt

    masks, means = [], []
    for i in range(BR):
        h = xp @ ap["w1"][i] + ap["b1"][i]
        h = jnp.maximum(bnorm(h, ap["g1"][i], ap["bt1"][i],
                              ap["rm1"][i], ap["rv1"][i]), 0.0)
        m = h @ ap["w2"][i] + ap["b2"][i]
        m = jax.nn.sigmoid(bnorm(m, ap["g2"][i], ap["bt2"][i],
                                 ap["rm2"][i], ap["rv2"][i]))
        masks.append(m.reshape(B, H, W)[:, None, :, :])
        means.append(jnp.mean(xp * (m + 1.0), axis=1))      # [B, C]

    def fc(x, w, b, g, bt, rm, rv, relu):
        y = bnorm(x @ w + b, g, bt, rm, rv)
        return jnp.maximum(y, 0.0) if relu else y

    if pool == "concat":
        feat = jnp.concatenate(means, axis=-1)
        h = fc(feat, fcp["w_fc1"], fcp["b_fc1"], fcp["g_fc1"], fcp["bt_fc1"],
               fcp["rm_fc1"], fcp["rv_fc1"], True)
        h = fc(h, fcp["w_fc2"], fcp["b_fc2"], fcp["g_fc2"], fcp["bt_fc2"],
               fcp["rm_fc2"], fcp["rv_fc2"], True)
    else:
        feat = sum(means)
        h = fc(feat, fcp["w_fc2"], fcp["b_fc2"], fcp["g_fc2"], fcp["bt_fc2"],
               fcp["rm_fc2"], fcp["rv_fc2"], True)
    out = h @ fcp["w_out"] + fcp["b_out"]
    return out, masks


if __name__ == "__main__":
    B, C, H, W = 2, 4, 16, 16
    output_dim = 8
    branch_number = 2
    pool = "concat"

    key = jax.random.PRNGKey(0)
    kx, kp = jax.random.split(key)
    x = jax.random.normal(kx, (B, C, H, W), jnp.float32)
    ap, fcp = init_params(kp, C, output_dim, branch_number, pool)

    # Weight prep runs ONCE (outside the jitted per-step forward).
    attn_pack, fc_layers, relu_flags = prepare_params(ap, fcp, pool)

    fwd = jax.jit(multi_branch_attention_forward,
                  static_argnames=("relu_flags", "pool"))
    out, multi_mask = fwd(x, attn_pack, fc_layers, relu_flags, pool)
    out = jax.block_until_ready(out)
    multi_mask = [jax.block_until_ready(m) for m in multi_mask]

    ref_out, ref_masks = ref_forward(x, ap, fcp, pool)
    assert out.shape == (B, output_dim)
    assert all(m.shape == (B, 1, H, W) for m in multi_mask)
    # Tolerances sized for bf16 MXU operands (~2^-9 per-operand rounding) with
    # f32 accumulation and f32 elementwise math; the folding itself is exact.
    assert jnp.allclose(out, ref_out, rtol=1e-2, atol=1e-2), "output mismatch"
    for m, rm in zip(multi_mask, ref_masks):
        assert jnp.allclose(m, rm, rtol=1e-2, atol=2e-2), "mask mismatch"

    print("KERNEL_OK")
</pallas_src>

<mosaic_0001>
module attributes {stable_mosaic.version = 11 : i64} {
  func.func @attention_kernel(%arg0: i32, %arg1: i32, %arg2: memref<2x4x256xf32, #tpu.memory_space<vmem>>, %arg3: memref<128x4xbf16, #tpu.memory_space<vmem>>, %arg4: memref<128x1xf32, #tpu.memory_space<vmem>>, %arg5: memref<2x128xbf16, #tpu.memory_space<vmem>>, %arg6: memref<2x1xf32, #tpu.memory_space<vmem>>, %arg7: memref<2x2x256xf32, #tpu.memory_space<vmem>>, %arg8: memref<2x4x2xf32, #tpu.memory_space<vmem>>) attributes {dimension_semantics = [#tpu.dimension_semantics<parallel>, #tpu.dimension_semantics<arbitrary>], iteration_bounds = array<i64: 1, 1>, scalar_prefetch = 0 : i64, scratch_operands = 0 : i64, tpu.core_type = #tpu.core_type<tc>, window_params = [{transform_indices = @transform_0, window_bounds = array<i64: 2, 4, 256>}, {pipeline_mode = #tpu.pipeline_mode<synchronous>, transform_indices = @transform_1, window_bounds = array<i64: 128, 4>}, {pipeline_mode = #tpu.pipeline_mode<synchronous>, transform_indices = @transform_2, window_bounds = array<i64: 128, 1>}, {pipeline_mode = #tpu.pipeline_mode<synchronous>, transform_indices = @transform_3, window_bounds = array<i64: 2, 128>}, {pipeline_mode = #tpu.pipeline_mode<synchronous>, transform_indices = @transform_4, window_bounds = array<i64: 2, 1>}, {transform_indices = @transform_5, window_bounds = array<i64: 2, 2, 256>}, {transform_indices = @transform_6, window_bounds = array<i64: 2, 4, 2>}]} {
    %c0_i32 = arith.constant 0 : i32
    %0 = arith.cmpi eq, %arg1, %c0_i32 : i32
    %1 = arith.extui %0 : i1 to i32
    %c0_i32_0 = arith.constant 0 : i32
    %2 = arith.cmpi ne, %1, %c0_i32_0 : i32
    scf.if %2 {
      %cst_44 = arith.constant 0.000000e+00 : f32
      %70 = vector.broadcast %cst_44 : f32 to vector<2x4x2xf32>
      %c0_45 = arith.constant 0 : index
      %c0_46 = arith.constant 0 : index
      %c0_47 = arith.constant 0 : index
      %71 = vector.load %arg8[%c0_45, %c0_46, %c0_47] : memref<2x4x2xf32, #tpu.memory_space<vmem>>, vector<2x4x2xf32>
      tpu.vector_store %arg8[%c0_45, %c0_46, %c0_47], %70 {strides = array<i32>} : memref<2x4x2xf32, #tpu.memory_space<vmem>>, vector<2x4x2xf32>,
    } else {
    }
    %c0 = arith.constant 0 : index
    %c0_1 = arith.constant 0 : index
    %3 = vector.load %arg3[%c0, %c0_1] : memref<128x4xbf16, #tpu.memory_space<vmem>>, vector<128x4xbf16>
    %c0_2 = arith.constant 0 : index
    %c0_3 = arith.constant 0 : index
    %4 = vector.load %arg4[%c0_2, %c0_3] : memref<128x1xf32, #tpu.memory_space<vmem>>, vector<128x1xf32>
    %c0_4 = arith.constant 0 : index
    %c0_5 = arith.constant 0 : index
    %5 = vector.load %arg5[%c0_4, %c0_5] : memref<2x128xbf16, #tpu.memory_space<vmem>>, vector<2x128xbf16>
    %c0_6 = arith.constant 0 : index
    %c0_7 = arith.constant 0 : index
    %6 = vector.load %arg6[%c0_6, %c0_7] : memref<2x1xf32, #tpu.memory_space<vmem>>, vector<2x1xf32>
    %c0_8 = arith.constant 0 : index
    %c0_9 = arith.constant 0 : index
    %c0_10 = arith.constant 0 : index
    %7 = vector.load %arg2[%c0_8, %c0_9, %c0_10] : memref<2x4x256xf32, #tpu.memory_space<vmem>>, vector<1x4x256xf32>
    %8 = vector.shape_cast %7 : vector<1x4x256xf32> to vector<4x256xf32>
    %9 = arith.truncf %8 : vector<4x256xf32> to vector<4x256xbf16>
    %cst = arith.constant dense<0.000000e+00> : vector<128x256xf32>
    %10 = tpu.matmul %3, %9, %cst {dimension_numbers = #tpu.dot_dimension_numbers<[1], [0], [0], [1], [0, 0, 1, 1], [], []>} : vector<128x4xbf16>, vector<4x256xbf16>, vector<128x256xf32> -> vector<128x256xf32>
    %11 = vector.broadcast %4 : vector<128x1xf32> to vector<128x256xf32>
    %12 = arith.addf %10, %11 : vector<128x256xf32>
    %cst_11 = arith.constant 0.000000e+00 : f32
    %13 = vector.broadcast %cst_11 : f32 to vector<128x256xf32>
    %14 = arith.maximumf %12, %13 : vector<128x256xf32>
    %15 = arith.truncf %14 : vector<128x256xf32> to vector<128x256xbf16>
    %cst_12 = arith.constant dense<0.000000e+00> : vector<2x256xf32>
    %16 = tpu.matmul %5, %15, %cst_12 {dimension_numbers = #tpu.dot_dimension_numbers<[1], [0], [0], [1], [0, 0, 1, 1], [], []>} : vector<2x128xbf16>, vector<128x256xbf16>, vector<2x256xf32> -> vector<2x256xf32>
    %17 = vector.broadcast %6 : vector<2x1xf32> to vector<2x256xf32>
    %18 = arith.addf %16, %17 : vector<2x256xf32>
    %19 = arith.negf %18 : vector<2x256xf32>
    %20 = math.exp %19 : vector<2x256xf32>
    %cst_13 = arith.constant 1.000000e+00 : f32
    %21 = vector.broadcast %cst_13 : f32 to vector<2x256xf32>
    %22 = arith.addf %21, %20 : vector<2x256xf32>
    %23 = arith.divf %21, %22 : vector<2x256xf32>
    %c0_14 = arith.constant 0 : index
    %c0_15 = arith.constant 0 : index
    %c0_16 = arith.constant 0 : index
    %24 = vector.load %arg7[%c0_14, %c0_15, %c0_16] : memref<2x2x256xf32, #tpu.memory_space<vmem>>, vector<1x2x256xf32>
    %25 = vector.shape_cast %24 : vector<1x2x256xf32> to vector<2x256xf32>
    %26 = vector.shape_cast %23 : vector<2x256xf32> to vector<1x2x256xf32>
    tpu.vector_store %arg7[%c0_14, %c0_15, %c0_16], %26 {strides = array<i32>} : memref<2x2x256xf32, #tpu.memory_space<vmem>>, vector<1x2x256xf32>,
    %c0_17 = arith.constant 0 : index
    %c0_18 = arith.constant 0 : index
    %c0_19 = arith.constant 0 : index
    %27 = vector.load %arg8[%c0_17, %c0_18, %c0_19] : memref<2x4x2xf32, #tpu.memory_space<vmem>>, vector<1x4x2xf32>
    %28 = vector.shape_cast %27 : vector<1x4x2xf32> to vector<4x2xf32>
    %cst_20 = arith.constant 1.000000e+00 : f32
    %29 = vector.broadcast %cst_20 : f32 to vector<2x256xf32>
    %30 = arith.addf %23, %29 : vector<2x256xf32>
    %31 = arith.truncf %30 : vector<2x256xf32> to vector<2x256xbf16>
    %cst_21 = arith.constant dense<0.000000e+00> : vector<4x2xf32>
    %32 = tpu.matmul %9, %31, %cst_21 {dimension_numbers = #tpu.dot_dimension_numbers<[1], [1], [0], [0], [0, 0, 1, 0], [], []>} : vector<4x256xbf16>, vector<2x256xbf16>, vector<4x2xf32> -> vector<4x2xf32>
    %33 = arith.addf %28, %32 : vector<4x2xf32>
    %c0_22 = arith.constant 0 : index
    %c0_23 = arith.constant 0 : index
    %c0_24 = arith.constant 0 : index
    %34 = vector.load %arg8[%c0_22, %c0_23, %c0_24] : memref<2x4x2xf32, #tpu.memory_space<vmem>>, vector<1x4x2xf32>
    %35 = vector.shape_cast %34 : vector<1x4x2xf32> to vector<4x2xf32>
    %36 = vector.shape_cast %33 : vector<4x2xf32> to vector<1x4x2xf32>
    tpu.vector_store %arg8[%c0_22, %c0_23, %c0_24], %36 {strides = array<i32>} : memref<2x4x2xf32, #tpu.memory_space<vmem>>, vector<1x4x2xf32>,
    %c1 = arith.constant 1 : index
    %c0_25 = arith.constant 0 : index
    %c0_26 = arith.constant 0 : index
    %37 = vector.load %arg2[%c1, %c0_25, %c0_26] : memref<2x4x256xf32, #tpu.memory_space<vmem>>, vector<1x4x256xf32>
    %38 = vector.shape_cast %37 : vector<1x4x256xf32> to vector<4x256xf32>
    %39 = arith.truncf %38 : vector<4x256xf32> to vector<4x256xbf16>
    %cst_27 = arith.constant dense<0.000000e+00> : vector<128x256xf32>
    %40 = tpu.matmul %3, %39, %cst_27 {dimension_numbers = #tpu.dot_dimension_numbers<[1], [0], [0], [1], [0, 0, 1, 1], [], []>} : vector<128x4xbf16>, vector<4x256xbf16>, vector<128x256xf32> -> vector<128x256xf32>
    %41 = vector.broadcast %4 : vector<128x1xf32> to vector<128x256xf32>
    %42 = arith.addf %40, %41 : vector<128x256xf32>
    %cst_28 = arith.constant 0.000000e+00 : f32
    %43 = vector.broadcast %cst_28 : f32 to vector<128x256xf32>
    %44 = arith.maximumf %42, %43 : vector<128x256xf32>
    %45 = arith.truncf %44 : vector<128x256xf32> to vector<128x256xbf16>
    %cst_29 = arith.constant dense<0.000000e+00> : vector<2x256xf32>
    %46 = tpu.matmul %5, %45, %cst_29 {dimension_numbers = #tpu.dot_dimension_numbers<[1], [0], [0], [1], [0, 0, 1, 1], [], []>} : vector<2x128xbf16>, vector<128x256xbf16>, vector<2x256xf32> -> vector<2x256xf32>
    %47 = vector.broadcast %6 : vector<2x1xf32> to vector<2x256xf32>
    %48 = arith.addf %46, %47 : vector<2x256xf32>
    %49 = arith.negf %48 : vector<2x256xf32>
    %50 = math.exp %49 : vector<2x256xf32>
    %cst_30 = arith.constant 1.000000e+00 : f32
    %51 = vector.broadcast %cst_30 : f32 to vector<2x256xf32>
    %52 = arith.addf %51, %50 : vector<2x256xf32>
    %53 = arith.divf %51, %52 : vector<2x256xf32>
    %c1_31 = arith.constant 1 : index
    %c0_32 = arith.constant 0 : index
    %c0_33 = arith.constant 0 : index
    %54 = vector.load %arg7[%c1_31, %c0_32, %c0_33] : memref<2x2x256xf32, #tpu.memory_space<vmem>>, vector<1x2x256xf32>
    %55 = vector.shape_cast %54 : vector<1x2x256xf32> to vector<2x256xf32>
    %56 = vector.shape_cast %53 : vector<2x256xf32> to vector<1x2x256xf32>
    tpu.vector_store %arg7[%c1_31, %c0_32, %c0_33], %56 {strides = array<i32>} : memref<2x2x256xf32, #tpu.memory_space<vmem>>, vector<1x2x256xf32>,
    %c1_34 = arith.constant 1 : index
    %c0_35 = arith.constant 0 : index
    %c0_36 = arith.constant 0 : index
    %57 = vector.load %arg8[%c1_34, %c0_35, %c0_36] : memref<2x4x2xf32, #tpu.memory_space<vmem>>, vector<1x4x2xf32>
    %58 = vector.shape_cast %57 : vector<1x4x2xf32> to vector<4x2xf32>
    %cst_37 = arith.constant 1.000000e+00 : f32
    %59 = vector.broadcast %cst_37 : f32 to vector<2x256xf32>
    %60 = arith.addf %53, %59 : vector<2x256xf32>
    %61 = arith.truncf %60 : vector<2x256xf32> to vector<2x256xbf16>
    %cst_38 = arith.constant dense<0.000000e+00> : vector<4x2xf32>
    %62 = tpu.matmul %39, %61, %cst_38 {dimension_numbers = #tpu.dot_dimension_numbers<[1], [1], [0], [0], [0, 0, 1, 0], [], []>} : vector<4x256xbf16>, vector<2x256xbf16>, vector<4x2xf32> -> vector<4x2xf32>
    %63 = arith.addf %58, %62 : vector<4x2xf32>
    %c1_39 = arith.constant 1 : index
    %c0_40 = arith.constant 0 : index
    %c0_41 = arith.constant 0 : index
    %64 = vector.load %arg8[%c1_39, %c0_40, %c0_41] : memref<2x4x2xf32, #tpu.memory_space<vmem>>, vector<1x4x2xf32>
    %65 = vector.shape_cast %64 : vector<1x4x2xf32> to vector<4x2xf32>
    %66 = vector.shape_cast %63 : vector<4x2xf32> to vector<1x4x2xf32>
    tpu.vector_store %arg8[%c1_39, %c0_40, %c0_41], %66 {strides = array<i32>} : memref<2x4x2xf32, #tpu.memory_space<vmem>>, vector<1x4x2xf32>,
    %c0_i32_42 = arith.constant 0 : i32
    %67 = arith.cmpi eq, %arg1, %c0_i32_42 : i32
    %68 = arith.extui %67 : i1 to i32
    %c0_i32_43 = arith.constant 0 : i32
    %69 = arith.cmpi ne, %68, %c0_i32_43 : i32
    scf.if %69 {
      %c0_44 = arith.constant 0 : index
      %c0_45 = arith.constant 0 : index
      %c0_46 = arith.constant 0 : index
      %70 = vector.load %arg8[%c0_44, %c0_45, %c0_46] : memref<2x4x2xf32, #tpu.memory_space<vmem>>, vector<2x4x2xf32>
      %cst_47 = arith.constant 3.906250e-03 : f32
      %71 = vector.broadcast %cst_47 : f32 to vector<2x4x2xf32>
      %72 = arith.mulf %70, %71 : vector<2x4x2xf32>
      %c0_48 = arith.constant 0 : index
      %c0_49 = arith.constant 0 : index
      %c0_50 = arith.constant 0 : index
      %73 = vector.load %arg8[%c0_48, %c0_49, %c0_50] : memref<2x4x2xf32, #tpu.memory_space<vmem>>, vector<2x4x2xf32>
      tpu.vector_store %arg8[%c0_48, %c0_49, %c0_50], %72 {strides = array<i32>} : memref<2x4x2xf32, #tpu.memory_space<vmem>>, vector<2x4x2xf32>,
    } else {
    }
    return
  }
  func.func @transform_0(%arg0: i32, %arg1: i32) -> (i32, i32, i32) {
    %c0_i32 = arith.constant 0 : i32
    %c0_i32_0 = arith.constant 0 : i32
    return %arg0, %c0_i32, %arg1 : i32, i32, i32
  }
  func.func @transform_1(%arg0: i32, %arg1: i32) -> (i32, i32) {
    %c0_i32 = arith.constant 0 : i32
    %c0_i32_0 = arith.constant 0 : i32
    %c0_i32_1 = arith.constant 0 : i32
    return %c0_i32, %c0_i32_0 : i32, i32
  }
  func.func @transform_2(%arg0: i32, %arg1: i32) -> (i32, i32) {
    %c0_i32 = arith.constant 0 : i32
    %c0_i32_0 = arith.constant 0 : i32
    %c0_i32_1 = arith.constant 0 : i32
    return %c0_i32, %c0_i32_0 : i32, i32
  }
  func.func @transform_3(%arg0: i32, %arg1: i32) -> (i32, i32) {
    %c0_i32 = arith.constant 0 : i32
    %c0_i32_0 = arith.constant 0 : i32
    %c0_i32_1 = arith.constant 0 : i32
    return %c0_i32, %c0_i32_0 : i32, i32
  }
  func.func @transform_4(%arg0: i32, %arg1: i32) -> (i32, i32) {
    %c0_i32 = arith.constant 0 : i32
    %c0_i32_0 = arith.constant 0 : i32
    %c0_i32_1 = arith.constant 0 : i32
    return %c0_i32, %c0_i32_0 : i32, i32
  }
  func.func @transform_5(%arg0: i32, %arg1: i32) -> (i32, i32, i32) {
    %c0_i32 = arith.constant 0 : i32
    %c0_i32_0 = arith.constant 0 : i32
    return %arg0, %c0_i32, %arg1 : i32, i32, i32
  }
  func.func @transform_6(%arg0: i32, %arg1: i32) -> (i32, i32, i32) {
    %c0_i32 = arith.constant 0 : i32
    %c0_i32_0 = arith.constant 0 : i32
    %c0_i32_1 = arith.constant 0 : i32
    return %arg0, %c0_i32, %c0_i32_0 : i32, i32, i32
  }
}

module attributes {stable_mosaic.version = 11 : i64} {
  func.func @fc_head_kernel(%arg0: i32, %arg1: memref<2x8xf32, #tpu.memory_space<vmem>>, %arg2: memref<8x4xbf16, #tpu.memory_space<vmem>>, %arg3: memref<1x4xf32, #tpu.memory_space<vmem>>, %arg4: memref<4x1024xbf16, #tpu.memory_space<vmem>>, %arg5: memref<1x1024xf32, #tpu.memory_space<vmem>>, %arg6: memref<1024x8xbf16, #tpu.memory_space<vmem>>, %arg7: memref<1x8xf32, #tpu.memory_space<vmem>>, %arg8: memref<2x8xf32, #tpu.memory_space<vmem>>) attributes {dimension_semantics = [#tpu.dimension_semantics<parallel>], iteration_bounds = array<i64: 1>, scalar_prefetch = 0 : i64, scratch_operands = 0 : i64, tpu.core_type = #tpu.core_type<tc>, window_params = [{transform_indices = @transform_0, window_bounds = array<i64: 2, 8>}, {pipeline_mode = #tpu.pipeline_mode<synchronous>, transform_indices = @transform_1, window_bounds = array<i64: 8, 4>}, {pipeline_mode = #tpu.pipeline_mode<synchronous>, transform_indices = @transform_2, window_bounds = array<i64: 1, 4>}, {pipeline_mode = #tpu.pipeline_mode<synchronous>, transform_indices = @transform_3, window_bounds = array<i64: 4, 1024>}, {pipeline_mode = #tpu.pipeline_mode<synchronous>, transform_indices = @transform_4, window_bounds = array<i64: 1, 1024>}, {pipeline_mode = #tpu.pipeline_mode<synchronous>, transform_indices = @transform_5, window_bounds = array<i64: 1024, 8>}, {pipeline_mode = #tpu.pipeline_mode<synchronous>, transform_indices = @transform_6, window_bounds = array<i64: 1, 8>}, {transform_indices = @transform_7, window_bounds = array<i64: 2, 8>}]} {
    %c0 = arith.constant 0 : index
    %c0_0 = arith.constant 0 : index
    %0 = vector.load %arg1[%c0, %c0_0] : memref<2x8xf32, #tpu.memory_space<vmem>>, vector<2x8xf32>
    %c0_1 = arith.constant 0 : index
    %c0_2 = arith.constant 0 : index
    %1 = vector.load %arg2[%c0_1, %c0_2] : memref<8x4xbf16, #tpu.memory_space<vmem>>, vector<8x4xbf16>
    %c0_3 = arith.constant 0 : index
    %c0_4 = arith.constant 0 : index
    %2 = vector.load %arg3[%c0_3, %c0_4] : memref<1x4xf32, #tpu.memory_space<vmem>>, vector<1x4xf32>
    %3 = arith.truncf %0 : vector<2x8xf32> to vector<2x8xbf16>
    %cst = arith.constant dense<0.000000e+00> : vector<2x4xf32>
    %4 = tpu.matmul %3, %1, %cst {dimension_numbers = #tpu.dot_dimension_numbers<[1], [0], [0], [1], [0, 0, 1, 1], [], []>} : vector<2x8xbf16>, vector<8x4xbf16>, vector<2x4xf32> -> vector<2x4xf32>
    %5 = vector.broadcast %2 : vector<1x4xf32> to vector<2x4xf32>
    %6 = arith.addf %4, %5 : vector<2x4xf32>
    %cst_5 = arith.constant 0.000000e+00 : f32
    %7 = vector.broadcast %cst_5 : f32 to vector<2x4xf32>
    %8 = arith.maximumf %6, %7 : vector<2x4xf32>
    %c0_6 = arith.constant 0 : index
    %c0_7 = arith.constant 0 : index
    %9 = vector.load %arg4[%c0_6, %c0_7] : memref<4x1024xbf16, #tpu.memory_space<vmem>>, vector<4x1024xbf16>
    %c0_8 = arith.constant 0 : index
    %c0_9 = arith.constant 0 : index
    %10 = vector.load %arg5[%c0_8, %c0_9] : memref<1x1024xf32, #tpu.memory_space<vmem>>, vector<1x1024xf32>
    %11 = arith.truncf %8 : vector<2x4xf32> to vector<2x4xbf16>
    %cst_10 = arith.constant dense<0.000000e+00> : vector<2x1024xf32>
    %12 = tpu.matmul %11, %9, %cst_10 {dimension_numbers = #tpu.dot_dimension_numbers<[1], [0], [0], [1], [0, 0, 1, 1], [], []>} : vector<2x4xbf16>, vector<4x1024xbf16>, vector<2x1024xf32> -> vector<2x1024xf32>
    %13 = vector.broadcast %10 : vector<1x1024xf32> to vector<2x1024xf32>
    %14 = arith.addf %12, %13 : vector<2x1024xf32>
    %cst_11 = arith.constant 0.000000e+00 : f32
    %15 = vector.broadcast %cst_11 : f32 to vector<2x1024xf32>
    %16 = arith.maximumf %14, %15 : vector<2x1024xf32>
    %c0_12 = arith.constant 0 : index
    %c0_13 = arith.constant 0 : index
    %17 = vector.load %arg6[%c0_12, %c0_13] : memref<1024x8xbf16, #tpu.memory_space<vmem>>, vector<1024x8xbf16>
    %c0_14 = arith.constant 0 : index
    %c0_15 = arith.constant 0 : index
    %18 = vector.load %arg7[%c0_14, %c0_15] : memref<1x8xf32, #tpu.memory_space<vmem>>, vector<1x8xf32>
    %19 = arith.truncf %16 : vector<2x1024xf32> to vector<2x1024xbf16>
    %cst_16 = arith.constant dense<0.000000e+00> : vector<2x8xf32>
    %20 = tpu.matmul %19, %17, %cst_16 {dimension_numbers = #tpu.dot_dimension_numbers<[1], [0], [0], [1], [0, 0, 1, 1], [], []>} : vector<2x1024xbf16>, vector<1024x8xbf16>, vector<2x8xf32> -> vector<2x8xf32>
    %21 = vector.broadcast %18 : vector<1x8xf32> to vector<2x8xf32>
    %22 = arith.addf %20, %21 : vector<2x8xf32>
    %c0_17 = arith.constant 0 : index
    %c0_18 = arith.constant 0 : index
    %23 = vector.load %arg8[%c0_17, %c0_18] : memref<2x8xf32, #tpu.memory_space<vmem>>, vector<2x8xf32>
    tpu.vector_store %arg8[%c0_17, %c0_18], %22 {strides = array<i32>} : memref<2x8xf32, #tpu.memory_space<vmem>>, vector<2x8xf32>,
    return
  }
  func.func @transform_0(%arg0: i32) -> (i32, i32) {
    %c0_i32 = arith.constant 0 : i32
    %c0_i32_0 = arith.constant 0 : i32
    return %arg0, %c0_i32 : i32, i32
  }
  func.func @transform_1(%arg0: i32) -> (i32, i32) {
    %c0_i32 = arith.constant 0 : i32
    %c0_i32_0 = arith.constant 0 : i32
    %c0_i32_1 = arith.constant 0 : i32
    return %c0_i32, %c0_i32_0 : i32, i32
  }
  func.func @transform_2(%arg0: i32) -> (i32, i32) {
    %c0_i32 = arith.constant 0 : i32
    %c0_i32_0 = arith.constant 0 : i32
    %c0_i32_1 = arith.constant 0 : i32
    return %c0_i32, %c0_i32_0 : i32, i32
  }
  func.func @transform_3(%arg0: i32) -> (i32, i32) {
    %c0_i32 = arith.constant 0 : i32
    %c0_i32_0 = arith.constant 0 : i32
    %c0_i32_1 = arith.constant 0 : i32
    return %c0_i32, %c0_i32_0 : i32, i32
  }
  func.func @transform_4(%arg0: i32) -> (i32, i32) {
    %c0_i32 = arith.constant 0 : i32
    %c0_i32_0 = arith.constant 0 : i32
    %c0_i32_1 = arith.constant 0 : i32
    return %c0_i32, %c0_i32_0 : i32, i32
  }
  func.func @transform_5(%arg0: i32) -> (i32, i32) {
    %c0_i32 = arith.constant 0 : i32
    %c0_i32_0 = arith.constant 0 : i32
    %c0_i32_1 = arith.constant 0 : i32
    return %c0_i32, %c0_i32_0 : i32, i32
  }
  func.func @transform_6(%arg0: i32) -> (i32, i32) {
    %c0_i32 = arith.constant 0 : i32
    %c0_i32_0 = arith.constant 0 : i32
    %c0_i32_1 = arith.constant 0 : i32
    return %c0_i32, %c0_i32_0 : i32, i32
  }
  func.func @transform_7(%arg0: i32) -> (i32, i32) {
    %c0_i32 = arith.constant 0 : i32
    %c0_i32_0 = arith.constant 0 : i32
    return %arg0, %c0_i32 : i32, i32
  }
}

</mosaic_0001>

<bundles_post_ra>
// kernel: squeeze.2
= control target key start
LH: loop header
LB: loop body
LE: loop exit
PB: predicated region body
PF: predicated region fallthrough
CT: control target
= control target key end

     0   :  { %s149_s0 = inlined_call_operand.vmem [shape: f32[2,256], index: 0, kind: input, shape index: {}]   ;;  %s150_s1 = inlined_call_operand.hbm [shape: f32[2,1,16,16], index: 1, kind: output, shape index: {}]  }
   0x1   :  { %v71_v0 = vld [vmem:[%s149_s0 + $0x2] sm:$0x3]  ;;  %v9_v1 = vld [vmem:[%s149_s0] sm:$0x3] }
   0x2   :  { %8 = vst [vmem:[#allocation2 + $0x8] sm:$0x3] %v71_v0  ;;  %10 = vst [vmem:[#allocation2] sm:$0x3] %v9_v1 }
   0x3   :  { %2 = vsyncpa [#allocation1], 0  ;;  %vm12_vm0 = vcmask 130048   ;;  %s104_s0 = smov 112   ;;  %s105_s10 = smov 80  }
   0x4   :  { %s106_s11 = smov 96   ;;  %s107_s12 = smov 64  }
   0x5   :  { %s108_s13 = smov 48   ;;  %s109_s14 = smov 32  }
   0x6   :  { %s110_s15 = smov 16   ;;  %s111_s16 = smov [#allocation0]  }
   0x7   :  { %s65_s17 = sshll.u32 %s111_s16, 4  ;;  %s66_s17 = int_to_ptr.vmem [resolvable:$true] %s65_s17 }
   0x8   :  { %s80_s18 = scalar_lea.vmem %s66_s17, 512  ;;  %p85_p1 = scmp.lt.s32.totalorder %s66_s17, %s66_s17 }
   0x9   :  { %v19_v2 = vld.sshfl [vmem:[#allocation2] sm:$0xff pattern:$0x99999180]   ;;  %p81_p0 = scmp.ne.s32.totalorder %s66_s17, %s80_s18  ;;  %p86_p2 = scmp.lt.s32.totalorder %s80_s18, %s80_s18 }
   0xa   :  { %v11_v3 = vld [vmem:[#allocation2] sm:$0x3]   ;;  %20 = vrot.lane.b32.xlu0 %v19_v2, %s104_s0  ;;  %32 = vrot.lane.b32.xlu1 %v19_v2, %s105_s10  ;;  %v15_v4 = vld [vmem:[#allocation2 + $0x8] sm:$0x3]  }
   0xb   :  { %13 = vst.msk [vmem:[#allocation0] ss:$16 sm:$0x3] %vm12_vm0, %v11_v3   ;;  %18 = vst.msk [vmem:[#allocation0 + $0x8] ss:$16 sm:$0x3] %vm12_vm0, %v15_v4   ;;  %p87_p3 = por %p86_p2, %p85_p1 }
   0xd   :  { %p88_p4 = pnand %p87_p3, %p81_p0 }
   0xe   :  { %26 = vrot.lane.b32.xlu0 %v19_v2, %s106_s11  ;;  %38 = vrot.lane.b32.xlu1 %v19_v2, %s107_s12 }
  0x12   :  { %44 = vrot.lane.b32.xlu0 %v19_v2, %s108_s13  ;;  %50 = vrot.lane.b32.xlu1 %v19_v2, %s109_s14 }
  0x16   :  { %56 = vrot.lane.b32.xlu0 %v19_v2, %s110_s15 }
  0x7c   :  { %v21_v5 = vpop.permute.xlu0 %20   ;;  %v33_v6 = vpop.permute.xlu1 %32  }
  0x7d   :  { %24 = vst.msk [vmem:[#allocation0 + $0x1] ss:$8 sm:$0xf] %vm12_vm0, %v21_v5   ;;  %36 = vst.msk [vmem:[#allocation0 + $0x3] ss:$8 sm:$0xf] %vm12_vm0, %v33_v6  }
  0x80   :  { %v27_v7 = vpop.permute.xlu0 %26   ;;  %v39_v8 = vpop.permute.xlu1 %38  }
  0x81   :  { %30 = vst.msk [vmem:[#allocation0 + $0x2] ss:$8 sm:$0xf] %vm12_vm0, %v27_v7   ;;  %42 = vst.msk [vmem:[#allocation0 + $0x4] ss:$8 sm:$0xf] %vm12_vm0, %v39_v8  }
  0x84   :  { %v45_v9 = vpop.permute.xlu0 %44   ;;  %v51_v10 = vpop.permute.xlu1 %50  }
  0x85   :  { %48 = vst.msk [vmem:[#allocation0 + $0x5] ss:$8 sm:$0xf] %vm12_vm0, %v45_v9   ;;  %54 = vst.msk [vmem:[#allocation0 + $0x6] ss:$8 sm:$0xf] %vm12_vm0, %v51_v10  }
  0x88   :  { %v57_v11 = vpop.permute.xlu0 %56  }
  0x89   :  { %60 = vst.msk [vmem:[#allocation0 + $0x7] ss:$8 sm:$0xf] %vm12_vm0, %v57_v11  }
  0x8a   :  { %91 = shalt.err (!%p88_p4)
}
  0x8b   :  { %s92_s21 = scalar_lea.hbm %s150_s1, 512 }
  0x8c   :  { %p93_p5 = scmp.ne.s32.totalorder %s150_s1, %s92_s21  ;;  %p96_p6 = scmp.lt.u32.totalorder %s92_s21, %s150_s1 }
  0x8e   :  { %p98_p7 = pnand %p96_p6, %p93_p5 }
  0x90   :  { %101 = shalt.err (!%p98_p7)
}
  0x91   :  { %68 = dma.vmem_to_hbm [thread:$0]  %s66_s17, 512, %s150_s1, [#allocation1]  }
  0x92   :  { %102 = dma.done.wait [#allocation1], 512  }
  0x93   :  { %103 = vsyncadd [#allocation1], 4294966784 }
  0x94   :  { %70 = vsyncpa [#allocation1], 1 }

// kernel: multi_branch_attention_forward.2
= control target key start
LH: loop header
LB: loop body
LE: loop exit
PB: predicated region body
PF: predicated region fallthrough
CT: control target
= control target key end

     0   :  { %12 = vsyncpa [#allocation3], 0  ;;  %s1477_s0 = inlined_call_operand.hbm [shape: f32[2,4,256], index: 0, kind: input, shape index: {}]   ;;  %s1478_s1 = inlined_call_operand.hbm [shape: bf16[128,4], index: 1, kind: input, shape index: {}]   ;;  %s1479_s2 = inlined_call_operand.hbm [shape: f32[128,1], index: 2, kind: input, shape index: {}]   ;;  %s1480_s3 = inlined_call_operand.hbm [shape: bf16[2,128], index: 3, kind: input, shape index: {}]   ;;  %s1481_s4 = inlined_call_operand.hbm [shape: f32[2,1], index: 4, kind: input, shape index: {}]   ;;  %s1482_s5 = inlined_call_operand.hbm [shape: f32[2,2,256], index: 5, kind: output, shape index: {0}]   ;;  %s1483_s6 = inlined_call_operand.hbm [shape: f32[2,4,2], index: 6, kind: output, shape index: {1}]  }
   0x1   :  { %13 = vsyncpa [#allocation6], 0 }
   0x2   :  { %14 = vsyncpa [#allocation9], 0 }
   0x3   :  { %15 = vsyncpa [#allocation4], 0 }
   0x4   :  { %16 = vsyncpa [#allocation13], 0  ;;  %s1136_s21 = smov [#allocation5]   ;;  %s972_s25 = scalar_lea.hbm %s1478_s1, 1024 }
   0x5   :  { %s34_s22 = sshll.u32 %s1136_s21, 4  ;;  %p973_p0 = scmp.ne.s32.totalorder %s1478_s1, %s972_s25  ;;  %s35_s22 = int_to_ptr.vmem [resolvable:$true] %s34_s22 }
   0x6   :  { %p976_p1 = scmp.lt.u32.totalorder %s972_s25, %s1478_s1 }
   0x8   :  { %p978_p2 = pnand %p976_p1, %p973_p0 }
   0xa   :  { %981 = shalt.err (!%p978_p2)
}
   0xb   :  { %s982_s30 = scalar_lea.vmem %s35_s22, 1024  ;;  %p987_p4 = scmp.lt.s32.totalorder %s35_s22, %s35_s22 }
   0xc   :  { %p983_p3 = scmp.ne.s32.totalorder %s35_s22, %s982_s30  ;;  %p988_p5 = scmp.lt.s32.totalorder %s982_s30, %s982_s30 }
   0xe   :  { %p989_p6 = por %p988_p5, %p987_p4 }
  0x10   :  { %p990_p7 = pnand %p989_p6, %p983_p3 }
  0x12   :  { %993 = shalt.err (!%p990_p7)
}
  0x13   :  { %s1137_s7 = smov 64   ;;  %s1138_s8 = smov 4  }
  0x14   :  { %40 = dma.hbm_to_vmem [thread:$0]  %s1478_s1, 1024, %s35_s22, [#allocation6], %s1137_s7, %s1137_s7, %s1138_s8  }
  0x15   :  { %s1139_s11 = smov [#allocation8]   ;;  %s1140_s13 = smov [#allocation2]  }
  0x16   :  { %s59_s12 = sshll.u32 %s1139_s11, 4  ;;  %s22_s14 = sshll.u32 %s1140_s13, 4  ;;  %s60_s12 = int_to_ptr.vmem [resolvable:$true] %s59_s12  ;;  %s23_s14 = int_to_ptr.vmem [resolvable:$true] %s22_s14 }
  0x17   :  { %s994_s17 = scalar_lea.hbm %s1480_s3, 16 }
  0x18   :  { %p995_p8 = scmp.ne.s32.totalorder %s1480_s3, %s994_s17  ;;  %p998_p9 = scmp.lt.u32.totalorder %s994_s17, %s1480_s3 }
  0x1a   :  { %p1000_p10 = pnand %p998_p9, %p995_p8 }
  0x1c   :  { %1003 = shalt.err (!%p1000_p10)
}
  0x1d   :  { %s1004_s1 = scalar_lea.vmem %s60_s12, 16  ;;  %s1008_s22 = scalar_lea.vmem %s60_s12, 32 }
  0x1e   :  { %p1005_p11 = scmp.ne.s32.totalorder %s60_s12, %s1004_s1  ;;  %p1009_p12 = scmp.lt.s32.totalorder %s60_s12, %s60_s12 }
  0x1f   :  { %p1010_p13 = scmp.lt.s32.totalorder %s1008_s22, %s1004_s1 }
  0x21   :  { %p1011_p0 = por %p1010_p13, %p1009_p12 }
  0x23   :  { %p1012_p1 = pnand %p1011_p0, %p1005_p11 }
  0x25   :  { %1015 = shalt.err (!%p1012_p1)
}
  0x26   :  { %62 = dma.hbm_to_vmem [thread:$0]  %s1480_s3, 16, %s60_s12, [#allocation9]  }
  0x27   :  { %s1016_s27 = scalar_lea.hbm %s1477_s0, 256 }
  0x28   :  { %p1017_p2 = scmp.ne.s32.totalorder %s1477_s0, %s1016_s27  ;;  %p1020_p3 = scmp.lt.u32.totalorder %s1016_s27, %s1477_s0 }
  0x2a   :  { %p1022_p4 = pnand %p1020_p3, %p1017_p2 }
  0x2c   :  { %1025 = shalt.err (!%p1022_p4)
}
  0x2d   :  { %s1026_s10 = scalar_lea.vmem %s23_s14, 256  ;;  %p1031_p6 = scmp.lt.s32.totalorder %s23_s14, %s23_s14 }
  0x2e   :  { %p1027_p5 = scmp.ne.s32.totalorder %s23_s14, %s1026_s10  ;;  %p1032_p7 = scmp.lt.s32.totalorder %s1026_s10, %s1026_s10 }
  0x30   :  { %p1033_p8 = por %p1032_p7, %p1031_p6 }
  0x32   :  { %p1034_p9 = pnand %p1033_p8, %p1027_p5 }
  0x34   :  { %1037 = shalt.err (!%p1034_p9)
}
  0x35   :  { %s1141_s3 = smov 128   ;;  %s1142_s11 = smov 8  }
  0x36   :  { %28 = dma.hbm_to_vmem [thread:$0]  %s1477_s0, 256, %s23_s14, [#allocation3], %s1141_s3, %s1141_s3, %s1142_s11  }
  0x37   :  { %s1143_s15 = smov [#allocation7]   ;;  %s1144_s17 = smov [#allocation10]  }
  0x38   :  { %s46_s16 = sshll.u32 %s1143_s15, 4  ;;  %s69_s18 = sshll.u32 %s1144_s17, 4  ;;  %s47_s16 = int_to_ptr.vmem [resolvable:$true] %s46_s16  ;;  %s70_s18 = int_to_ptr.vmem [resolvable:$true] %s69_s18 }
  0x39   :  { %s1038_s21 = scalar_lea.hbm %s1479_s2, 2048 }
  0x3a   :  { %p1039_p10 = scmp.ne.s32.totalorder %s1479_s2, %s1038_s21  ;;  %p1042_p11 = scmp.lt.u32.totalorder %s1038_s21, %s1479_s2 }
  0x3c   :  { %p1044_p12 = pnand %p1042_p11, %p1039_p10 }
  0x3e   :  { %1047 = shalt.err (!%p1044_p12)
}
  0x3f   :  { %s1048_s0 = scalar_lea.vmem %s47_s16, 2048  ;;  %p1053_p0 = scmp.lt.s32.totalorder %s47_s16, %s47_s16 }
  0x40   :  { %p1049_p13 = scmp.ne.s32.totalorder %s47_s16, %s1048_s0  ;;  %p1054_p1 = scmp.lt.s32.totalorder %s1048_s0, %s1048_s0 }
  0x42   :  { %p1055_p2 = por %p1054_p1, %p1053_p0 }
  0x44   :  { %p1056_p3 = pnand %p1055_p2, %p1049_p13 }
  0x46   :  { %1059 = shalt.err (!%p1056_p3)
}
  0x47   :  { %52 = dma.hbm_to_vmem [thread:$0]  %s1479_s2, 2048, %s47_s16, [#allocation6], %s1141_s3, %s1141_s3, %s1142_s11  }
  0x48   :  { %s1060_s28 = scalar_lea.hbm %s1481_s4, 32 }
  0x49   :  { %p1061_p4 = scmp.ne.s32.totalorder %s1481_s4, %s1060_s28  ;;  %p1064_p5 = scmp.lt.u32.totalorder %s1060_s28, %s1481_s4 }
  0x4b   :  { %p1066_p6 = pnand %p1064_p5, %p1061_p4 }
  0x4d   :  { %1069 = shalt.err (!%p1066_p6)
}
  0x4e   :  { %s1070_s12 = scalar_lea.vmem %s70_s18, 32  ;;  %p1075_p8 = scmp.lt.s32.totalorder %s70_s18, %s70_s18 }
  0x4f   :  { %p1071_p7 = scmp.ne.s32.totalorder %s70_s18, %s1070_s12  ;;  %p1076_p9 = scmp.lt.s32.totalorder %s1070_s12, %s1070_s12 }
  0x51   :  { %p1077_p10 = por %p1076_p9, %p1075_p8 }
  0x53   :  { %p1078_p11 = pnand %p1077_p10, %p1071_p7 }
  0x55   :  { %1081 = shalt.err (!%p1078_p11)
}
  0x56   :  { %72 = dma.hbm_to_vmem [thread:$0]  %s1481_s4, 32, %s70_s18, [#allocation9]  }
  0x57   :  { %1126 = dma.done.wait [#allocation3], 256  }
  0x58   :  { %1127 = vsyncadd [#allocation3], 4294967040 }
  0x59   :  { %1128 = dma.done.wait [#allocation6], 3072  }
  0x5a   :  { %1129 = vsyncadd [#allocation6], 4294964224 }
  0x5b   :  { %1130 = dma.done.wait [#allocation9], 48  }
  0x5c   :  { %1131 = vsyncadd [#allocation9], 4294967248  ;;  %v1145_v0 = vmov 0   ;;  %v130_v1 = vld [vmem:[#allocation2] sm:$0xff]  ;;  %vm281_vm0 = vcmask 1041408   ;;  %v1259_v6 = vld [vmem:[#allocation5] sm:$0xff]  }
  0x5d   :  { %320 = vmatprep.mubr.bf16.mxu0 %v1145_v0  ;;  %944 = vset.pattern.permute.xlu0 %v1145_v0  ;;  %v132_v2 = vcombine.high %v130_v1, %v130_v1  ;;  %v1251_v3 = vpack.c.bf16 %v130_v1, %v130_v1  ;;  %vm256_vm1 = vcmask 31744   ;;  %v112_v7 = vld [vmem:[#allocation7] sm:$0xff]  ;;  %v114_v8 = vld [vmem:[#allocation7 + $0x10] sm:$0xff]  ;;  %v113_v9 = vld [vmem:[#allocation7 + $0x8] sm:$0xff]  ;;  %vm93_vm2 = vcmask 11264   ;;  %s1147_s4 = smov [#allocation11]  }
  0x5e   :  { %945 = vset.pattern.permute.xlu1 %v1145_v0  ;;  %486 = vmatprep.mubr.bf16.mxu1 %v1145_v0  ;;  %v115_v10 = vld [vmem:[#allocation7 + $0x18] sm:$0xff]  ;;  %v1264_v11 = vld [vmem:[#allocation5 + $0x8] sm:$0xff]   ;;  %v116_v12 = vld [vmem:[#allocation7 + $0x20] sm:$0xff]  ;;  %s869_s11 = sshll.u32 %s1147_s4, 4  ;;  %s870_s11 = int_to_ptr.vmem [resolvable:$true] %s869_s11 }
  0x5f   :  { %v1253_v4 = vpack.c.bf16 %v132_v2, %v132_v2  ;;  %v283_v5 = vsel %vm281_vm0, %v1251_v3, 0  ;;  %138 = vperm.xlu0 %944, %v112_v7   ;;  %148 = vperm.xlu1 %945, %v114_v8   ;;  %v117_v13 = vld [vmem:[#allocation7 + $0x28] sm:$0xff]  ;;  %v118_v14 = vld [vmem:[#allocation7 + $0x30] sm:$0xff]  ;;  %v119_v15 = vld [vmem:[#allocation7 + $0x38] sm:$0xff]  ;;  %s1082_s13 = scalar_lea.vmem %s870_s11, 128  ;;  %p1087_p13 = scmp.lt.s32.totalorder %s870_s11, %s870_s11 }
  0x60   :  { %v1269_v16 = vld [vmem:[#allocation5 + $0x10] sm:$0xff]   ;;  %v120_v17 = vld [vmem:[#allocation7 + $0x40] sm:$0xff]  ;;  %v121_v18 = vld [vmem:[#allocation7 + $0x48] sm:$0xff]  ;;  %p1083_p12 = scmp.ne.s32.totalorder %s870_s11, %s1082_s13  ;;  %p1088_p0 = scmp.lt.s32.totalorder %s1082_s13, %s1082_s13 }
  0x61   :  { %907 = vmatprep.subr.msk.bf16.mxu0 %vm281_vm0, %v1253_v4  ;;  %v122_v19 = vld [vmem:[#allocation7 + $0x50] sm:$0xff]  ;;  %v123_v20 = vld [vmem:[#allocation7 + $0x58] sm:$0xff]  ;;  %v124_v22 = vld [vmem:[#allocation7 + $0x60] sm:$0xff] }
  0x62   :  { %289 = vmatpush1.bf16.msra.mxu0 %v283_v5  ;;  %v1274_v21 = vld [vmem:[#allocation5 + $0x18] sm:$0xff]   ;;  %v125_v23 = vld [vmem:[#allocation7 + $0x68] sm:$0xff]  ;;  %v126_v24 = vld [vmem:[#allocation7 + $0x70] sm:$0xff]  ;;  %p1089_p1 = por %p1088_p0, %p1087_p13 }
  0x63   :  { %143 = vperm.xlu0 %944, %v113_v9   ;;  %153 = vperm.xlu1 %945, %v115_v10   ;;  %v127_v25 = vld [vmem:[#allocation7 + $0x78] sm:$0xff]  ;;  %v1279_v26 = vld [vmem:[#allocation5 + $0x20] sm:$0xff]   ;;  %v1284_v28 = vld [vmem:[#allocation5 + $0x28] sm:$0xff]  }
  0x64   :  { %v129_v27 = vld [vmem:[#allocation10] sm:$0x3]  ;;  %v1289_v29 = vld [vmem:[#allocation5 + $0x30] sm:$0xff]   ;;  %v1294_v30 = vld [vmem:[#allocation5 + $0x38] sm:$0xff]   ;;  %p1090_p2 = pnand %p1089_p1, %p1083_p12 }
  0x65   :  { %908 = vmatmul.mubr.msk.bf16.vlgmr.msra.gmra.mrb[0].mxu0 %vm256_vm1, %v1259_v6 }
  0x66   :  { %330 = vmatprep.mubr.bf16.mxu0 %v1145_v0 }
  0x67   :  { %158 = vperm.xlu0 %944, %v116_v12   ;;  %163 = vperm.xlu1 %945, %v117_v13  }
  0x6b   :  { %168 = vperm.xlu0 %944, %v118_v14   ;;  %173 = vperm.xlu1 %945, %v119_v15  }
  0x6d   :  { %909 = vmatmul.mubr.msk.bf16.gmra.mrb[4].mxu0 %vm256_vm1, %v1264_v11 }
  0x6e   :  { %340 = vmatprep.mubr.bf16.mxu0 %v1145_v0 }
  0x6f   :  { %178 = vperm.xlu0 %944, %v120_v17   ;;  %183 = vperm.xlu1 %945, %v121_v18  }
  0x73   :  { %188 = vperm.xlu0 %944, %v122_v19   ;;  %193 = vperm.xlu1 %945, %v123_v20  }
  0x75   :  { %910 = vmatmul.mubr.msk.bf16.gmra.mrb[8].mxu0 %vm256_vm1, %v1269_v16 }
  0x76   :  { %350 = vmatprep.mubr.bf16.mxu0 %v1145_v0 }
  0x77   :  { %198 = vperm.xlu0 %944, %v124_v22   ;;  %203 = vperm.xlu1 %945, %v125_v23  }
  0x7b   :  { %208 = vperm.xlu0 %944, %v126_v24   ;;  %213 = vperm.xlu1 %945, %v127_v25  }
  0x7d   :  { %911 = vmatmul.mubr.msk.bf16.gmra.mrb[12].mxu0 %vm256_vm1, %v1274_v21 }
  0x7e   :  { %360 = vmatprep.mubr.bf16.mxu0 %v1145_v0 }
  0x7f   :  { %451 = vperm.xlu0 %944, %v129_v27  }
  0x85   :  { %912 = vmatmul.mubr.msk.bf16.gmra.mrb[16].mxu0 %vm256_vm1, %v1279_v26 }
  0x86   :  { %370 = vmatprep.mubr.bf16.mxu0 %v1145_v0 }
  0x8d   :  { %913 = vmatmul.mubr.msk.bf16.gmra.mrb[20].mxu0 %vm256_vm1, %v1284_v28 }
  0x8e   :  { %380 = vmatprep.mubr.bf16.mxu0 %v1145_v0 }
  0x95   :  { %914 = vmatmul.mubr.msk.bf16.gmra.mrb[24].mxu0 %vm256_vm1, %v1289_v29 }
  0x96   :  { %390 = vmatprep.mubr.bf16.mxu0 %v1145_v0 }
  0x9d   :  { %915 = vmatmul.mubr.msk.bf16.gmra.mrb[28].mxu0 %vm256_vm1, %v1294_v30 }
  0x9e   :  { %773 = vmatprep.mubr.bf16.mxu0 %v1145_v0 }
  0xde   :  { %v1299_v31 = vpop.permute.xlu0 %138  ;;  %v1306_v40 = vpop.permute.xlu1 %148 }
  0xe2   :  { %v1302_v35 = vpop.permute.xlu0 %143  ;;  %v1310_v51 = vpop.permute.xlu1 %153 }
  0xe6   :  { %v1315_v62 = vpop.permute.xlu0 %158  ;;  %v1318_v7 = vpop.permute.xlu1 %163 }
  0xea   :  { %v1323_v20 = vpop.permute.xlu0 %168  ;;  %v1326_v27 = vpop.permute.xlu1 %173 }
 0x138   :  { %v322_v32 = vpop.f32.mrb[0].mxu0 }
 0x139   :  { %v323_v33 = vadd.f32 %v322_v32, %v1299_v31  ;;  %v324_v34 = vpop.f32.mrb[1].mxu0 }
 0x13a   :  { %v325_v36 = vadd.f32 %v324_v34, %v1299_v31  ;;  %v326_v37 = vpop.f32.mrb[2].mxu0 }
 0x13b   :  { %v327_v38 = vadd.f32 %v326_v37, %v1302_v35  ;;  %v328_v39 = vpop.f32.mrb[3].mxu0  ;;  %v401_v42 = vmax.f32 %v323_v33, 0.0 }
 0x13c   :  { %v329_v41 = vadd.f32 %v328_v39, %v1302_v35  ;;  %v402_v44 = vmax.f32 %v325_v36, 0.0 }
 0x13d   :  { %v403_v43 = vmax.f32 %v327_v38, 0.0 }
 0x13e   :  { %v404_v45 = vmax.f32 %v329_v41, 0.0 }
 0x13f   :  { %v433_v46 = vpack.c.bf16 %v403_v43, %v401_v42 }
 0x140   :  { %v332_v47 = vpop.f32.mrb[4].mxu0  ;;  %v434_v48 = vpack.c.bf16 %v404_v45, %v402_v44  ;;  %v1331_v44 = vpop.permute.xlu0 %178 }
 0x141   :  { %v333_v49 = vadd.f32 %v332_v47, %v1306_v40  ;;  %v334_v50 = vpop.f32.mrb[5].mxu0 }
 0x142   :  { %v335_v52 = vadd.f32 %v334_v50, %v1306_v40  ;;  %v336_v53 = vpop.f32.mrb[6].mxu0  ;;  %454 = vmatprep.subr.bf16.mxu1 %v434_v48 }
 0x143   :  { %v337_v54 = vadd.f32 %v336_v53, %v1310_v51  ;;  %v338_v55 = vpop.f32.mrb[7].mxu0  ;;  %455 = vmatpush1.bf16.msra.mxu1 %v433_v46  ;;  %v405_v57 = vmax.f32 %v333_v49, 0.0  ;;  %v1334_v49 = vpop.permute.xlu1 %183 }
 0x144   :  { %v339_v56 = vadd.f32 %v338_v55, %v1310_v51  ;;  %v406_v59 = vmax.f32 %v335_v52, 0.0 }
 0x145   :  { %v407_v58 = vmax.f32 %v337_v54, 0.0 }
 0x146   :  { %v408_v60 = vmax.f32 %v339_v56, 0.0 }
 0x147   :  { %v435_v61 = vpack.c.bf16 %v407_v58, %v405_v57 }
 0x148   :  { %v436_v63 = vpack.c.bf16 %v408_v60, %v406_v59  ;;  %v342_v1 = vpop.f32.mrb[8].mxu0 }
 0x149   :  { %v343_v2 = vadd.f32 %v342_v1, %v1315_v62  ;;  %v344_v5 = vpop.f32.mrb[9].mxu0 }
 0x14a   :  { %v345_v8 = vadd.f32 %v344_v5, %v1315_v62  ;;  %v346_v9 = vpop.f32.mrb[10].mxu0  ;;  %456 = vmatprep.subr.bf16.mxu1 %v436_v63 }
 0x14b   :  { %v347_v10 = vadd.f32 %v346_v9, %v1318_v7  ;;  %v348_v12 = vpop.f32.mrb[11].mxu0  ;;  %457 = vmatpush1.bf16.msra.mxu1 %v435_v61  ;;  %v409_v14 = vmax.f32 %v343_v2, 0.0  ;;  %v1339_v61 = vpop.permute.xlu0 %188 }
 0x14c   :  { %v349_v13 = vadd.f32 %v348_v12, %v1318_v7  ;;  %v410_v17 = vmax.f32 %v345_v8, 0.0  ;;  %v1342_v8 = vpop.permute.xlu1 %193 }
 0x14d   :  { %v411_v15 = vmax.f32 %v347_v10, 0.0 }
 0x14e   :  { %v412_v18 = vmax.f32 %v349_v13, 0.0 }
 0x14f   :  { %v437_v19 = vpack.c.bf16 %v411_v15, %v409_v14 }
 0x150   :  { %v438_v22 = vpack.c.bf16 %v412_v18, %v410_v17  ;;  %v352_v23 = vpop.f32.mrb[12].mxu0 }
 0x151   :  { %v353_v24 = vadd.f32 %v352_v23, %v1323_v20  ;;  %v354_v25 = vpop.f32.mrb[13].mxu0  ;;  %v1347_v23 = vpop.permute.xlu0 %198 }
 0x152   :  { %v355_v32 = vadd.f32 %v354_v25, %v1323_v20  ;;  %v356_v33 = vpop.f32.mrb[14].mxu0  ;;  %458 = vmatprep.subr.bf16.mxu1 %v438_v22 }
 0x153   :  { %v357_v34 = vadd.f32 %v356_v33, %v1326_v27  ;;  %v358_v36 = vpop.f32.mrb[15].mxu0  ;;  %459 = vmatpush1.bf16.msra.mxu1 %v437_v19  ;;  %v413_v38 = vmax.f32 %v353_v24, 0.0 }
 0x154   :  { %v359_v37 = vadd.f32 %v358_v36, %v1326_v27  ;;  %v414_v41 = vmax.f32 %v355_v32, 0.0 }
 0x155   :  { %v415_v39 = vmax.f32 %v357_v34, 0.0  ;;  %v1350_v34 = vpop.permute.xlu1 %203 }
 0x156   :  { %v416_v42 = vmax.f32 %v359_v37, 0.0 }
 0x157   :  { %v439_v43 = vpack.c.bf16 %v415_v39, %v413_v38 }
 0x158   :  { %v440_v45 = vpack.c.bf16 %v416_v42, %v414_v41  ;;  %v362_v46 = vpop.f32.mrb[16].mxu0 }
 0x159   :  { %v363_v47 = vadd.f32 %v362_v46, %v1331_v44  ;;  %v364_v48 = vpop.f32.mrb[17].mxu0 }
 0x15a   :  { %v365_v50 = vadd.f32 %v364_v48, %v1331_v44  ;;  %v366_v52 = vpop.f32.mrb[18].mxu0  ;;  %460 = vmatprep.subr.bf16.mxu1 %v440_v45  ;;  %v1355_v48 = vpop.permute.xlu0 %208 }
 0x15b   :  { %v367_v53 = vadd.f32 %v366_v52, %v1334_v49  ;;  %v368_v54 = vpop.f32.mrb[19].mxu0  ;;  %461 = vmatpush1.bf16.msra.mxu1 %v439_v43  ;;  %v417_v56 = vmax.f32 %v363_v47, 0.0 }
 0x15c   :  { %v369_v55 = vadd.f32 %v368_v54, %v1334_v49  ;;  %v418_v58 = vmax.f32 %v365_v50, 0.0 }
 0x15d   :  { %v419_v57 = vmax.f32 %v367_v53, 0.0 }
 0x15e   :  { %v420_v59 = vmax.f32 %v369_v55, 0.0  ;;  %v1358_v55 = vpop.permute.xlu1 %213 }
 0x15f   :  { %v441_v60 = vpack.c.bf16 %v419_v57, %v417_v56 }
 0x160   :  { %v442_v63 = vpack.c.bf16 %v420_v59, %v418_v58  ;;  %v372_v1 = vpop.f32.mrb[20].mxu0 }
 0x161   :  { %v373_v2 = vadd.f32 %v372_v1, %v1339_v61  ;;  %v374_v5 = vpop.f32.mrb[21].mxu0 }
 0x162   :  { %v375_v9 = vadd.f32 %v374_v5, %v1339_v61  ;;  %v376_v10 = vpop.f32.mrb[22].mxu0  ;;  %462 = vmatprep.subr.bf16.mxu1 %v442_v63 }
 0x163   :  { %v377_v12 = vadd.f32 %v376_v10, %v1342_v8  ;;  %v378_v13 = vpop.f32.mrb[23].mxu0  ;;  %463 = vmatpush1.bf16.msra.mxu1 %v441_v60  ;;  %v421_v15 = vmax.f32 %v373_v2, 0.0 }
 0x164   :  { %v379_v14 = vadd.f32 %v378_v13, %v1342_v8  ;;  %v422_v18 = vmax.f32 %v375_v9, 0.0  ;;  %v1146_v13 = vmov 0.0  }
 0x165   :  { %v423_v17 = vmax.f32 %v377_v12, 0.0  ;;  %v1363_v12 = vld [vmem:[#allocation8] sm:$0x1]  ;;  %94 = vst.msk [vmem:[#allocation12] sm:$0xf] %vm93_vm2, %v1146_v13 }
 0x166   :  { %v424_v19 = vmax.f32 %v379_v14, 0.0  ;;  %95 = vst.msk [vmem:[#allocation12 + $0x4] sm:$0xf] %vm93_vm2, %v1146_v13  ;;  %v1369_v14 = vpop.permute.xlu0 %451 }
 0x167   :  { %v443_v22 = vpack.c.bf16 %v423_v17, %v421_v15 }
 0x168   :  { %v444_v24 = vpack.c.bf16 %v424_v19, %v422_v18  ;;  %v382_v25 = vpop.f32.mrb[24].mxu0 }
 0x169   :  { %v383_v32 = vadd.f32 %v382_v25, %v1347_v23  ;;  %v384_v33 = vpop.f32.mrb[25].mxu0 }
 0x16a   :  { %v385_v36 = vadd.f32 %v384_v33, %v1347_v23  ;;  %v386_v37 = vpop.f32.mrb[26].mxu0  ;;  %464 = vmatprep.subr.bf16.mxu1 %v444_v24 }
 0x16b   :  { %v387_v38 = vadd.f32 %v386_v37, %v1350_v34  ;;  %v388_v39 = vpop.f32.mrb[27].mxu0  ;;  %465 = vmatpush1.bf16.msra.mxu1 %v443_v22  ;;  %v425_v42 = vmax.f32 %v383_v32, 0.0 }
 0x16c   :  { %v389_v41 = vadd.f32 %v388_v39, %v1350_v34  ;;  %v426_v45 = vmax.f32 %v385_v36, 0.0 }
 0x16d   :  { %v427_v43 = vmax.f32 %v387_v38, 0.0  ;;  %v568_v38 = vld [vmem:[#allocation2 + $0x8] sm:$0xff] }
 0x16e   :  { %v428_v46 = vmax.f32 %v389_v41, 0.0  ;;  %v570_v41 = vcombine.high %v568_v38, %v568_v38 }
 0x16f   :  { %v445_v47 = vpack.c.bf16 %v427_v43, %v425_v42 }
 0x170   :  { %v446_v50 = vpack.c.bf16 %v428_v46, %v426_v45  ;;  %v392_v52 = vpop.f32.mrb[28].mxu0 }
 0x171   :  { %v393_v53 = vadd.f32 %v392_v52, %v1355_v48  ;;  %v394_v54 = vpop.f32.mrb[29].mxu0 }
 0x172   :  { %v395_v56 = vadd.f32 %v394_v54, %v1355_v48  ;;  %v396_v57 = vpop.f32.mrb[30].mxu0  ;;  %466 = vmatprep.subr.bf16.mxu1 %v446_v50  ;;  %v1373_v50 = vpack.c.bf16 %v570_v41, %v570_v41 }
 0x173   :  { %v397_v58 = vadd.f32 %v396_v57, %v1358_v55  ;;  %v398_v59 = vpop.f32.mrb[31].mxu0  ;;  %467 = vmatpush1.bf16.msra.mxu1 %v445_v47  ;;  %v429_v63 = vmax.f32 %v393_v53, 0.0  ;;  %v1377_v53 = vpack.c.bf16 %v568_v38, %v568_v38 }
 0x174   :  { %v399_v60 = vadd.f32 %v398_v59, %v1358_v55  ;;  %v430_v2 = vmax.f32 %v395_v56, 0.0 }
 0x175   :  { %v431_v1 = vmax.f32 %v397_v58, 0.0  ;;  %v575_v54 = vsel %vm281_vm0, %v1377_v53, 0 }
 0x176   :  { %v432_v5 = vmax.f32 %v399_v60, 0.0 }
 0x177   :  { %v447_v9 = vpack.c.bf16 %v431_v1, %v429_v63 }
 0x178   :  { %v448_v10 = vpack.c.bf16 %v432_v5, %v430_v2 }
 0x17a   :  { %468 = vmatprep.subr.bf16.mxu1 %v448_v10 }
 0x17b   :  { %469 = vmatpush1.bf16.msra.mxu1 %v447_v9 }
 0x17e   :  { %487 = vmatmul.mubr.bf16.vlgmr.msra.gmra.mrb[0].mxu1 %v1363_v12 }
 0x17f   :  { %556 = vmatprep.mubr.bf16.mxu1 %v1253_v4 }
 0x251   :  { %v488_v15 = vpop.f32.mrb[0].mxu1 }
 0x252   :  { %v489_v17 = vadd.f32 %v488_v15, %v1369_v14  ;;  %v490_v18 = vpop.f32.mrb[1].mxu1 }
 0x253   :  { %v491_v19 = vadd.f32 %v490_v18, %v1369_v14  ;;  %v492_v22 = vpop.f32.mrb[2].mxu1 }
 0x254   :  { %v916_v24 = vmul.f32 -1.442695, %v489_v17  ;;  %v493_v25 = vpop.f32.mrb[3].mxu1 }
 0x255   :  { %v917_v32 = vmul.f32 -1.442695, %v491_v19 }
 0x256   :  { %956 = vpow2.f32 %v916_v24 }
 0x257   :  { %958 = vpow2.f32 %v917_v32 }
 0x260   :  { %v957_v4 = vpop.eup %956 }
 0x261   :  { %v959_v33 = vpop.eup %958  ;;  %v501_v36 = vadd.f32 1.0, %v957_v4 }
 0x262   :  { %v502_v37 = vadd.f32 1.0, %v959_v33 }
 0x263   :  { %960 = vrcp.f32 %v501_v36 }
 0x264   :  { %962 = vrcp.f32 %v502_v37 }
 0x26d   :  { %v961_v39 = vpop.eup %960 }
 0x26e   :  { %v963_v42 = vpop.eup %962  ;;  %v520_v43 = vadd.f32 1.0, %v961_v39 }
 0x26f   :  { %v521_v45 = vadd.f32 1.0, %v963_v42  ;;  %v509_v46 = vcombine.low %v961_v39, %v963_v42 }
 0x270   :  { %v522_v52 = vpack.c.bf16 %v520_v43, %v520_v43 }
 0x271   :  { %v523_v47 = vpack.c.bf16 %v521_v45, %v521_v45  ;;  %918 = vst.sshfl [vmem:[#allocation11] sm:$0x33 pattern:$0x76325410] %v509_v46 }
 0x273   :  { %524 = vmatprep.subr.bf16.mxu1 %v523_v47 }
 0x274   :  { %525 = vmatpush1.bf16.xpose.msra.mxu1 %v522_v52 }
 0x275   :  { %919 = vmatprep.subr.msk.bf16.mxu1 %vm281_vm0, %v1373_v50 }
 0x27b   :  { %557 = vmatmul.mubr.bf16.vlgmr.msra.gmra.mrb[4].mxu1 %v1251_v3  ;;  %v519_v3 = vld [vmem:[#allocation12] sm:$0xf] }
 0x27c   :  { %581 = vmatpush1.bf16.msra.mxu1 %v575_v54  ;;  %612 = vmatprep.mubr.bf16.mxu1 %v1145_v0 }
 0x283   :  { %920 = vmatmul.mubr.msk.bf16.vlgmr.msra.gmra.mrb[8].mxu1 %vm256_vm1, %v1259_v6 }
 0x284   :  { %622 = vmatprep.mubr.bf16.mxu1 %v1145_v0 }
 0x28b   :  { %921 = vmatmul.mubr.msk.bf16.gmra.mrb[12].mxu1 %vm256_vm1, %v1264_v11 }
 0x28c   :  { %632 = vmatprep.mubr.bf16.mxu1 %v1145_v0 }
 0x293   :  { %922 = vmatmul.mubr.msk.bf16.gmra.mrb[16].mxu1 %vm256_vm1, %v1269_v16 }
 0x294   :  { %642 = vmatprep.mubr.bf16.mxu1 %v1145_v0 }
 0x29b   :  { %923 = vmatmul.mubr.msk.bf16.gmra.mrb[20].mxu1 %vm256_vm1, %v1274_v21 }
 0x29c   :  { %652 = vmatprep.mubr.bf16.mxu1 %v1145_v0 }
 0x2a3   :  { %924 = vmatmul.mubr.msk.bf16.gmra.mrb[24].mxu1 %vm256_vm1, %v1279_v26 }
 0x2a4   :  { %662 = vmatprep.mubr.bf16.mxu1 %v1145_v0 }
 0x2ab   :  { %925 = vmatmul.mubr.msk.bf16.gmra.mrb[28].mxu1 %vm256_vm1, %v1284_v28 }
 0x2ac   :  { %672 = vmatprep.mubr.bf16.mxu1 %v1145_v0 }
 0x2b3   :  { %926 = vmatmul.mubr.msk.bf16.gmra.mrb[32].mxu1 %vm256_vm1, %v1289_v29 }
 0x2b4   :  { %682 = vmatprep.mubr.bf16.mxu1 %v1145_v0 }
 0x2bb   :  { %927 = vmatmul.mubr.msk.bf16.gmra.mrb[36].mxu1 %vm256_vm1, %v1294_v30 }
 0x34e   :  { %v558_v6 = vpop.f32.mrb[4].mxu1 }
 0x34f   :  { %v564_v11 = vadd.f32 %v558_v6, %v519_v3  ;;  %v560_v16 = vpop.f32.mrb[5].mxu1 }
 0x350   :  { %v561_v21 = vpop.f32.mrb[6].mxu1 }
 0x351   :  { %566 = vst.msk [vmem:[#allocation12] sm:$0xf] %vm93_vm2, %v564_v11  ;;  %v562_v26 = vpop.f32.mrb[7].mxu1 }
 0x356   :  { %v614_v56 = vpop.f32.mrb[8].mxu1 }
 0x357   :  { %v615_v28 = vadd.f32 %v614_v56, %v1299_v31  ;;  %v616_v57 = vpop.f32.mrb[9].mxu1 }
 0x358   :  { %v617_v58 = vadd.f32 %v616_v57, %v1299_v31  ;;  %v618_v29 = vpop.f32.mrb[10].mxu1  ;;  %v858_v59 = vld [vmem:[#allocation12] sm:$0xf] }
 0x359   :  { %v619_v0 = vadd.f32 %v618_v29, %v1302_v35  ;;  %v620_v60 = vpop.f32.mrb[11].mxu1  ;;  %v860_v30 = vmul.f32 0.00390625, %v858_v59  ;;  %v693_v1 = vmax.f32 %v615_v28, 0.0 }
 0x35a   :  { %v621_v63 = vadd.f32 %v620_v60, %v1302_v35  ;;  %v694_v5 = vmax.f32 %v617_v58, 0.0 }
 0x35b   :  { %v695_v2 = vmax.f32 %v619_v0, 0.0  ;;  %862 = vst.msk [vmem:[#allocation12] sm:$0xf] %vm93_vm2, %v860_v30 }
 0x35c   :  { %v696_v9 = vmax.f32 %v621_v63, 0.0 }
 0x35d   :  { %v725_v10 = vpack.c.bf16 %v695_v2, %v693_v1 }
 0x35e   :  { %v726_v13 = vpack.c.bf16 %v696_v9, %v694_v5  ;;  %v624_v15 = vpop.f32.mrb[12].mxu1 }
 0x35f   :  { %v625_v17 = vadd.f32 %v624_v15, %v1306_v40  ;;  %v626_v31 = vpop.f32.mrb[13].mxu1 }
 0x360   :  { %v627_v18 = vadd.f32 %v626_v31, %v1306_v40  ;;  %v628_v19 = vpop.f32.mrb[14].mxu1  ;;  %741 = vmatprep.subr.bf16.mxu0 %v726_v13 }
 0x361   :  { %v629_v22 = vadd.f32 %v628_v19, %v1310_v51  ;;  %v630_v24 = vpop.f32.mrb[15].mxu1  ;;  %742 = vmatpush1.bf16.msra.mxu0 %v725_v10  ;;  %v697_v25 = vmax.f32 %v625_v17, 0.0 }
 0x362   :  { %v631_v35 = vadd.f32 %v630_v24, %v1310_v51  ;;  %v698_v4 = vmax.f32 %v627_v18, 0.0 }
 0x363   :  { %v699_v32 = vmax.f32 %v629_v22, 0.0 }
 0x364   :  { %v700_v33 = vmax.f32 %v631_v35, 0.0 }
 0x365   :  { %v727_v36 = vpack.c.bf16 %v699_v32, %v697_v25 }
 0x366   :  { %v728_v37 = vpack.c.bf16 %v700_v33, %v698_v4  ;;  %v634_v38 = vpop.f32.mrb[16].mxu1 }
 0x367   :  { %v635_v39 = vadd.f32 %v634_v38, %v1315_v62  ;;  %v636_v41 = vpop.f32.mrb[17].mxu1 }
 0x368   :  { %v637_v40 = vadd.f32 %v636_v41, %v1315_v62  ;;  %v638_v42 = vpop.f32.mrb[18].mxu1  ;;  %743 = vmatprep.subr.bf16.mxu0 %v728_v37 }
 0x369   :  { %v639_v43 = vadd.f32 %v638_v42, %v1318_v7  ;;  %v640_v45 = vpop.f32.mrb[19].mxu1  ;;  %744 = vmatpush1.bf16.msra.mxu0 %v727_v36  ;;  %v701_v46 = vmax.f32 %v635_v39, 0.0 }
 0x36a   :  { %v641_v51 = vadd.f32 %v640_v45, %v1318_v7  ;;  %v702_v52 = vmax.f32 %v637_v40, 0.0 }
 0x36b   :  { %v703_v47 = vmax.f32 %v639_v43, 0.0 }
 0x36c   :  { %v704_v54 = vmax.f32 %v641_v51, 0.0 }
 0x36d   :  { %v729_v3 = vpack.c.bf16 %v703_v47, %v701_v46 }
 0x36e   :  { %v730_v6 = vpack.c.bf16 %v704_v54, %v702_v52  ;;  %v644_v11 = vpop.f32.mrb[20].mxu1 }
 0x36f   :  { %v645_v16 = vadd.f32 %v644_v11, %v1323_v20  ;;  %v646_v21 = vpop.f32.mrb[21].mxu1 }
 0x370   :  { %v647_v62 = vadd.f32 %v646_v21, %v1323_v20  ;;  %v648_v26 = vpop.f32.mrb[22].mxu1  ;;  %745 = vmatprep.subr.bf16.mxu0 %v730_v6 }
 0x371   :  { %v649_v56 = vadd.f32 %v648_v26, %v1326_v27  ;;  %v650_v28 = vpop.f32.mrb[23].mxu1  ;;  %746 = vmatpush1.bf16.msra.mxu0 %v729_v3  ;;  %v705_v57 = vmax.f32 %v645_v16, 0.0 }
 0x372   :  { %v651_v7 = vadd.f32 %v650_v28, %v1326_v27  ;;  %v706_v29 = vmax.f32 %v647_v62, 0.0 }
 0x373   :  { %v707_v58 = vmax.f32 %v649_v56, 0.0 }
 0x374   :  { %v708_v59 = vmax.f32 %v651_v7, 0.0 }
 0x375   :  { %v731_v0 = vpack.c.bf16 %v707_v58, %v705_v57 }
 0x376   :  { %v732_v60 = vpack.c.bf16 %v708_v59, %v706_v29  ;;  %v654_v30 = vpop.f32.mrb[24].mxu1 }
 0x377   :  { %v655_v63 = vadd.f32 %v654_v30, %v1331_v44  ;;  %v656_v1 = vpop.f32.mrb[25].mxu1 }
 0x378   :  { %v657_v20 = vadd.f32 %v656_v1, %v1331_v44  ;;  %v658_v2 = vpop.f32.mrb[26].mxu1  ;;  %747 = vmatprep.subr.bf16.mxu0 %v732_v60 }
 0x379   :  { %v659_v5 = vadd.f32 %v658_v2, %v1334_v49  ;;  %v660_v9 = vpop.f32.mrb[27].mxu1  ;;  %748 = vmatpush1.bf16.msra.mxu0 %v731_v0  ;;  %v709_v10 = vmax.f32 %v655_v63, 0.0 }
 0x37a   :  { %v661_v27 = vadd.f32 %v660_v9, %v1334_v49  ;;  %v710_v15 = vmax.f32 %v657_v20, 0.0 }
 0x37b   :  { %v711_v13 = vmax.f32 %v659_v5, 0.0 }
 0x37c   :  { %v712_v17 = vmax.f32 %v661_v27, 0.0 }
 0x37d   :  { %v733_v31 = vpack.c.bf16 %v711_v13, %v709_v10 }
 0x37e   :  { %v734_v18 = vpack.c.bf16 %v712_v17, %v710_v15  ;;  %v664_v19 = vpop.f32.mrb[28].mxu1 }
 0x37f   :  { %v665_v22 = vadd.f32 %v664_v19, %v1339_v61  ;;  %v666_v24 = vpop.f32.mrb[29].mxu1 }
 0x380   :  { %v667_v44 = vadd.f32 %v666_v24, %v1339_v61  ;;  %v668_v35 = vpop.f32.mrb[30].mxu1  ;;  %749 = vmatprep.subr.bf16.mxu0 %v734_v18 }
 0x381   :  { %v669_v25 = vadd.f32 %v668_v35, %v1342_v8  ;;  %v670_v32 = vpop.f32.mrb[31].mxu1  ;;  %750 = vmatpush1.bf16.msra.mxu0 %v733_v31  ;;  %v713_v4 = vmax.f32 %v665_v22, 0.0 }
 0x382   :  { %v671_v49 = vadd.f32 %v670_v32, %v1342_v8  ;;  %v714_v36 = vmax.f32 %v667_v44, 0.0 }
 0x383   :  { %v715_v33 = vmax.f32 %v669_v25, 0.0 }
 0x384   :  { %v716_v37 = vmax.f32 %v671_v49, 0.0 }
 0x385   :  { %v735_v38 = vpack.c.bf16 %v715_v33, %v713_v4 }
 0x386   :  { %v736_v39 = vpack.c.bf16 %v716_v37, %v714_v36  ;;  %v674_v41 = vpop.f32.mrb[32].mxu1 }
 0x387   :  { %v675_v40 = vadd.f32 %v674_v41, %v1347_v23  ;;  %v676_v42 = vpop.f32.mrb[33].mxu1 }
 0x388   :  { %v677_v61 = vadd.f32 %v676_v42, %v1347_v23  ;;  %v678_v43 = vpop.f32.mrb[34].mxu1  ;;  %751 = vmatprep.subr.bf16.mxu0 %v736_v39 }
 0x389   :  { %v679_v45 = vadd.f32 %v678_v43, %v1350_v34  ;;  %v680_v51 = vpop.f32.mrb[35].mxu1  ;;  %752 = vmatpush1.bf16.msra.mxu0 %v735_v38  ;;  %v717_v46 = vmax.f32 %v675_v40, 0.0 }
 0x38a   :  { %v681_v8 = vadd.f32 %v680_v51, %v1350_v34  ;;  %v718_v52 = vmax.f32 %v677_v61, 0.0 }
 0x38b   :  { %v719_v47 = vmax.f32 %v679_v45, 0.0 }
 0x38c   :  { %v720_v54 = vmax.f32 %v681_v8, 0.0 }
 0x38d   :  { %v737_v3 = vpack.c.bf16 %v719_v47, %v717_v46 }
 0x38e   :  { %v738_v6 = vpack.c.bf16 %v720_v54, %v718_v52  ;;  %v684_v11 = vpop.f32.mrb[36].mxu1 }
 0x38f   :  { %v685_v16 = vadd.f32 %v684_v11, %v1355_v48  ;;  %v686_v21 = vpop.f32.mrb[37].mxu1 }
 0x390   :  { %v687_v23 = vadd.f32 %v686_v21, %v1355_v48  ;;  %v688_v62 = vpop.f32.mrb[38].mxu1  ;;  %753 = vmatprep.subr.bf16.mxu0 %v738_v6 }
 0x391   :  { %v689_v26 = vadd.f32 %v688_v62, %v1358_v55  ;;  %v690_v56 = vpop.f32.mrb[39].mxu1  ;;  %754 = vmatpush1.bf16.msra.mxu0 %v737_v3  ;;  %v721_v28 = vmax.f32 %v685_v16, 0.0 }
 0x392   :  { %v691_v34 = vadd.f32 %v690_v56, %v1358_v55  ;;  %v722_v57 = vmax.f32 %v687_v23, 0.0 }
 0x393   :  { %v723_v7 = vmax.f32 %v689_v26, 0.0 }
 0x394   :  { %v724_v58 = vmax.f32 %v691_v34, 0.0 }
 0x395   :  { %v739_v29 = vpack.c.bf16 %v723_v7, %v721_v28 }
 0x396   :  { %v740_v59 = vpack.c.bf16 %v724_v58, %v722_v57 }
 0x398   :  { %755 = vmatprep.subr.bf16.mxu0 %v740_v59 }
 0x399   :  { %756 = vmatpush1.bf16.msra.mxu0 %v739_v29 }
 0x39c   :  { %774 = vmatmul.mubr.bf16.vlgmr.msra.gmra.mrb[32].mxu0 %v1363_v12 }
 0x39d   :  { %845 = vmatprep.mubr.bf16.mxu0 %v1373_v50 }
 0x46f   :  { %v775_v48 = vpop.f32.mrb[32].mxu0 }
 0x470   :  { %v776_v0 = vadd.f32 %v775_v48, %v1369_v14  ;;  %v777_v60 = vpop.f32.mrb[33].mxu0 }
 0x471   :  { %v778_v30 = vadd.f32 %v777_v60, %v1369_v14  ;;  %v779_v63 = vpop.f32.mrb[34].mxu0 }
 0x472   :  { %v928_v55 = vmul.f32 -1.442695, %v776_v0  ;;  %v780_v1 = vpop.f32.mrb[35].mxu0 }
 0x473   :  { %v929_v20 = vmul.f32 -1.442695, %v778_v30 }
 0x474   :  { %964 = vpow2.f32 %v928_v55 }
 0x475   :  { %966 = vpow2.f32 %v929_v20 }
 0x47e   :  { %v965_v2 = vpop.eup %964 }
 0x47f   :  { %v967_v5 = vpop.eup %966  ;;  %v788_v9 = vadd.f32 1.0, %v965_v2 }
 0x480   :  { %v789_v27 = vadd.f32 1.0, %v967_v5 }
 0x481   :  { %968 = vrcp.f32 %v788_v9 }
 0x482   :  { %970 = vrcp.f32 %v789_v27 }
 0x48b   :  { %v969_v12 = vpop.eup %968 }
 0x48c   :  { %v971_v50 = vpop.eup %970  ;;  %v809_v10 = vadd.f32 1.0, %v969_v12 }
 0x48d   :  { %v810_v13 = vadd.f32 1.0, %v971_v50  ;;  %v796_v15 = vcombine.low %v969_v12, %v971_v50 }
 0x48e   :  { %v811_v14 = vpack.c.bf16 %v809_v10, %v809_v10 }
 0x48f   :  { %v812_v17 = vpack.c.bf16 %v810_v13, %v810_v13  ;;  %930 = vst.sshfl [vmem:[#allocation11 + $0x4] sm:$0x33 pattern:$0x76325410] %v796_v15 }
 0x491   :  { %813 = vmatprep.subr.bf16.mxu0 %v812_v17 }
 0x492   :  { %814 = vmatpush1.bf16.xpose.msra.mxu0 %v811_v14 }
 0x499   :  { %846 = vmatmul.mubr.bf16.vlgmr.msra.gmra.mrb[36].mxu0 %v1377_v53 }
 0x49a   :  { %1093 = shalt.err (!%p1090_p2)
}
 0x49b   :  { %s1094_s17 = scalar_lea.hbm %s1482_s5, 128 }
 0x49c   :  { %p1095_p3 = scmp.ne.s32.totalorder %s1482_s5, %s1094_s17  ;;  %p1098_p4 = scmp.lt.u32.totalorder %s1094_s17, %s1482_s5 }
 0x49e   :  { %p1100_p5 = pnand %p1098_p4, %p1095_p3 }
 0x4a0   :  { %1103 = shalt.err (!%p1100_p5)
}
 0x4a1   :  { %875 = dma.vmem_to_hbm [thread:$0]  %s870_s11, 128, %s1482_s5, [#allocation4], %s1137_s7, %s1137_s7, %s1138_s8   ;;  %v808_v53 = vld [vmem:[#allocation12 + $0x4] sm:$0xf] }
 0x4a2   :  { %s1148_s23 = smov [#allocation12]  }
 0x4a3   :  { %s881_s24 = sshll.u32 %s1148_s23, 4  ;;  %s882_s24 = int_to_ptr.vmem [resolvable:$true] %s881_s24 }
 0x4a4   :  { %s1104_s0 = scalar_lea.vmem %s882_s24, 128  ;;  %p1109_p7 = scmp.lt.s32.totalorder %s882_s24, %s882_s24 }
 0x4a5   :  { %p1105_p6 = scmp.ne.s32.totalorder %s882_s24, %s1104_s0  ;;  %p1110_p8 = scmp.lt.s32.totalorder %s1104_s0, %s1104_s0 }
 0x4a7   :  { %p1111_p9 = por %p1110_p8, %p1109_p7 }
 0x4a9   :  { %p1112_p10 = pnand %p1111_p9, %p1105_p6 }
 0x56c   :  { %v847_v31 = vpop.f32.mrb[36].mxu0 }
 0x56d   :  { %v853_v18 = vadd.f32 %v847_v31, %v808_v53  ;;  %v849_v19 = vpop.f32.mrb[37].mxu0 }
 0x56e   :  { %v850_v22 = vpop.f32.mrb[38].mxu0 }
 0x56f   :  { %854 = vst.msk [vmem:[#allocation12 + $0x4] sm:$0xf] %vm93_vm2, %v853_v18  ;;  %v851_v24 = vpop.f32.mrb[39].mxu0 }
 0x576   :  { %v859_v44 = vld [vmem:[#allocation12 + $0x4] sm:$0xf] }
 0x577   :  { %v861_v35 = vmul.f32 0.00390625, %v859_v44 }
 0x579   :  { %863 = vst.msk [vmem:[#allocation12 + $0x4] sm:$0xf] %vm93_vm2, %v861_v35 }
 0x57a   :  { %1115 = shalt.err (!%p1112_p10)
}
 0x57b   :  { %s1116_s25 = scalar_lea.hbm %s1483_s6, 128 }
 0x57c   :  { %p1117_p11 = scmp.ne.s32.totalorder %s1483_s6, %s1116_s25  ;;  %p1120_p12 = scmp.lt.u32.totalorder %s1116_s25, %s1483_s6 }
 0x57e   :  { %p1122_p13 = pnand %p1120_p12, %p1117_p11 }
 0x580   :  { %1125 = shalt.err (!%p1122_p13)
}
 0x581   :  { %887 = dma.vmem_to_hbm [thread:$0]  %s882_s24, 128, %s1483_s6, [#allocation13], %s1137_s7, %s1137_s7, %s1138_s8  }
 0x582   :  { %1132 = dma.done.wait [#allocation4], 128  }
 0x583   :  { %1133 = vsyncadd [#allocation4], 4294967168 }
 0x584   :  { %1134 = dma.done.wait [#allocation13], 128  }
 0x585   :  { %1135 = vsyncadd [#allocation13], 4294967168 }
 0x586   :  { %894 = vsyncpa [#allocation3], 1 }
 0x587   :  { %895 = vsyncpa [#allocation6], 1 }
 0x588   :  { %896 = vsyncpa [#allocation9], 1 }
 0x589   :  { %897 = vsyncpa [#allocation4], 1 }
 0x58a   :  { %898 = vsyncpa [#allocation13], 1 }

// kernel: multi_branch_attention_forward.3
= control target key start
LH: loop header
LB: loop body
LE: loop exit
PB: predicated region body
PF: predicated region fallthrough
CT: control target
= control target key end

     0   :  { %12 = vsyncpa [#allocation3], 0  ;;  %s1785_s0 = inlined_call_operand.hbm [shape: f32[2,8], index: 0, kind: input, shape index: {}]   ;;  %s1786_s1 = inlined_call_operand.hbm [shape: bf16[8,4], index: 1, kind: input, shape index: {}]   ;;  %s1787_s2 = inlined_call_operand.hbm [shape: f32[1,4], index: 2, kind: input, shape index: {}]   ;;  %s1788_s3 = inlined_call_operand.hbm [shape: bf16[4,1024], index: 3, kind: input, shape index: {}]   ;;  %s1789_s4 = inlined_call_operand.hbm [shape: f32[1,1024], index: 4, kind: input, shape index: {}]   ;;  %s1790_s5 = inlined_call_operand.hbm [shape: bf16[1024,8], index: 5, kind: input, shape index: {}]   ;;  %s1791_s6 = inlined_call_operand.hbm [shape: f32[1,8], index: 6, kind: input, shape index: {}]   ;;  %s1792_s7 = inlined_call_operand.hbm [shape: f32[2,8], index: 7, kind: output, shape index: {}]  }
   0x1   :  { %13 = vsyncpa [#allocation6], 0 }
   0x2   :  { %14 = vsyncpa [#allocation9], 0 }
   0x3   :  { %15 = vsyncpa [#allocation12], 0 }
   0x4   :  { %16 = vsyncpa [#allocation4], 0  ;;  %s1596_s24 = smov [#allocation5]   ;;  %s1597_s26 = smov [#allocation8]  }
   0x5   :  { %s33_s25 = sshll.u32 %s1596_s24, 4  ;;  %s53_s27 = sshll.u32 %s1597_s26, 4  ;;  %s34_s25 = int_to_ptr.vmem [resolvable:$true] %s33_s25  ;;  %s54_s27 = int_to_ptr.vmem [resolvable:$true] %s53_s27 }
   0x6   :  { %s1410_s30 = scalar_lea.hbm %s1786_s1, 64 }
   0x7   :  { %p1411_p0 = scmp.ne.s32.totalorder %s1786_s1, %s1410_s30  ;;  %p1414_p1 = scmp.lt.u32.totalorder %s1410_s30, %s1786_s1 }
   0x9   :  { %p1416_p2 = pnand %p1414_p1, %p1411_p0 }
   0xb   :  { %1419 = shalt.err (!%p1416_p2)
}
   0xc   :  { %s1420_s12 = scalar_lea.vmem %s34_s25, 64  ;;  %p1425_p4 = scmp.lt.s32.totalorder %s34_s25, %s34_s25 }
   0xd   :  { %p1421_p3 = scmp.ne.s32.totalorder %s34_s25, %s1420_s12  ;;  %p1426_p5 = scmp.lt.s32.totalorder %s1420_s12, %s1420_s12 }
   0xf   :  { %p1427_p6 = por %p1426_p5, %p1425_p4 }
  0x11   :  { %p1428_p7 = pnand %p1427_p6, %p1421_p3 }
  0x13   :  { %1431 = shalt.err (!%p1428_p7)
}
  0x14   :  { %36 = dma.hbm_to_vmem [thread:$0]  %s1786_s1, 64, %s34_s25, [#allocation6]  }
  0x15   :  { %s1432_s17 = scalar_lea.hbm %s1788_s3, 256 }
  0x16   :  { %p1433_p8 = scmp.ne.s32.totalorder %s1788_s3, %s1432_s17  ;;  %p1436_p9 = scmp.lt.u32.totalorder %s1432_s17, %s1788_s3 }
  0x18   :  { %p1438_p10 = pnand %p1436_p9, %p1433_p8 }
  0x1a   :  { %1441 = shalt.err (!%p1438_p10)
}
  0x1b   :  { %s1442_s22 = scalar_lea.vmem %s54_s27, 256  ;;  %p1447_p12 = scmp.lt.s32.totalorder %s54_s27, %s54_s27 }
  0x1c   :  { %p1443_p11 = scmp.ne.s32.totalorder %s54_s27, %s1442_s22  ;;  %p1448_p13 = scmp.lt.s32.totalorder %s1442_s22, %s1442_s22 }
  0x1e   :  { %p1449_p0 = por %p1448_p13, %p1447_p12 }
  0x20   :  { %p1450_p1 = pnand %p1449_p0, %p1443_p11 }
  0x22   :  { %1453 = shalt.err (!%p1450_p1)
}
  0x23   :  { %56 = dma.hbm_to_vmem [thread:$0]  %s1788_s3, 256, %s54_s27, [#allocation9]  }
  0x24   :  { %s1598_s24 = smov [#allocation11]   ;;  %s1454_s29 = scalar_lea.hbm %s1790_s5, 8192 }
  0x25   :  { %s72_s25 = sshll.u32 %s1598_s24, 4  ;;  %p1455_p2 = scmp.ne.s32.totalorder %s1790_s5, %s1454_s29  ;;  %s73_s25 = int_to_ptr.vmem [resolvable:$true] %s72_s25 }
  0x26   :  { %p1458_p3 = scmp.lt.u32.totalorder %s1454_s29, %s1790_s5 }
  0x28   :  { %p1460_p4 = pnand %p1458_p3, %p1455_p2 }
  0x2a   :  { %1463 = shalt.err (!%p1460_p4)
}
  0x2b   :  { %s1464_s11 = scalar_lea.vmem %s73_s25, 8192  ;;  %p1469_p6 = scmp.lt.s32.totalorder %s73_s25, %s73_s25 }
  0x2c   :  { %p1465_p5 = scmp.ne.s32.totalorder %s73_s25, %s1464_s11  ;;  %p1470_p7 = scmp.lt.s32.totalorder %s1464_s11, %s1464_s11 }
  0x2e   :  { %p1471_p8 = por %p1470_p7, %p1469_p6 }
  0x30   :  { %p1472_p9 = pnand %p1471_p8, %p1465_p5 }
  0x32   :  { %1475 = shalt.err (!%p1472_p9)
}
  0x33   :  { %s1599_s3 = smov 64   ;;  %s1600_s27 = smov 4  }
  0x34   :  { %78 = dma.hbm_to_vmem [thread:$0]  %s1790_s5, 8192, %s73_s25, [#allocation12], %s1599_s3, %s1599_s3, %s1600_s27  }
  0x35   :  { %s1601_s14 = smov [#allocation2]   ;;  %s1602_s16 = smov [#allocation7]  }
  0x36   :  { %s23_s15 = sshll.u32 %s1601_s14, 4  ;;  %s43_s17 = sshll.u32 %s1602_s16, 4  ;;  %s24_s15 = int_to_ptr.vmem [resolvable:$true] %s23_s15  ;;  %s44_s17 = int_to_ptr.vmem [resolvable:$true] %s43_s17 }
  0x37   :  { %s1476_s20 = scalar_lea.hbm %s1785_s0, 32 }
  0x38   :  { %p1477_p10 = scmp.ne.s32.totalorder %s1785_s0, %s1476_s20  ;;  %p1480_p11 = scmp.lt.u32.totalorder %s1476_s20, %s1785_s0 }
  0x3a   :  { %p1482_p12 = pnand %p1480_p11, %p1477_p10 }
  0x3c   :  { %1485 = shalt.err (!%p1482_p12)
}
  0x3d   :  { %s1486_s5 = scalar_lea.vmem %s24_s15, 32  ;;  %p1491_p0 = scmp.lt.s32.totalorder %s24_s15, %s24_s15 }
  0x3e   :  { %p1487_p13 = scmp.ne.s32.totalorder %s24_s15, %s1486_s5  ;;  %p1492_p1 = scmp.lt.s32.totalorder %s1486_s5, %s1486_s5 }
  0x40   :  { %p1493_p2 = por %p1492_p1, %p1491_p0 }
  0x42   :  { %p1494_p3 = pnand %p1493_p2, %p1487_p13 }
  0x44   :  { %1497 = shalt.err (!%p1494_p3)
}
  0x45   :  { %26 = dma.hbm_to_vmem [thread:$0]  %s1785_s0, 32, %s24_s15, [#allocation3]  }
  0x46   :  { %s1498_s29 = scalar_lea.hbm %s1787_s2, 16 }
  0x47   :  { %p1499_p4 = scmp.ne.s32.totalorder %s1787_s2, %s1498_s29  ;;  %p1502_p5 = scmp.lt.u32.totalorder %s1498_s29, %s1787_s2 }
  0x49   :  { %p1504_p6 = pnand %p1502_p5, %p1499_p4 }
  0x4b   :  { %1507 = shalt.err (!%p1504_p6)
}
  0x4c   :  { %s1508_s11 = scalar_lea.vmem %s44_s17, 16  ;;  %s1512_s3 = scalar_lea.vmem %s44_s17, 32 }
  0x4d   :  { %p1509_p7 = scmp.ne.s32.totalorder %s44_s17, %s1508_s11  ;;  %p1513_p8 = scmp.lt.s32.totalorder %s44_s17, %s44_s17 }
  0x4e   :  { %p1514_p9 = scmp.lt.s32.totalorder %s1512_s3, %s1508_s11 }
  0x50   :  { %p1515_p10 = por %p1514_p9, %p1513_p8 }
  0x52   :  { %p1516_p11 = pnand %p1515_p10, %p1509_p7 }
  0x54   :  { %1519 = shalt.err (!%p1516_p11)
}
  0x55   :  { %46 = dma.hbm_to_vmem [thread:$0]  %s1787_s2, 16, %s44_s17, [#allocation6]  }
  0x56   :  { %s1603_s12 = smov [#allocation10]   ;;  %s1604_s14 = smov [#allocation13]  }
  0x57   :  { %s63_s13 = sshll.u32 %s1603_s12, 4  ;;  %s85_s15 = sshll.u32 %s1604_s14, 4  ;;  %s64_s13 = int_to_ptr.vmem [resolvable:$true] %s63_s13  ;;  %s86_s15 = int_to_ptr.vmem [resolvable:$true] %s85_s15 }
  0x58   :  { %s1520_s19 = scalar_lea.hbm %s1789_s4, 128 }
  0x59   :  { %p1521_p12 = scmp.ne.s32.totalorder %s1789_s4, %s1520_s19  ;;  %p1524_p13 = scmp.lt.u32.totalorder %s1520_s19, %s1789_s4 }
  0x5b   :  { %p1526_p0 = pnand %p1524_p13, %p1521_p12 }
  0x5d   :  { %1529 = shalt.err (!%p1526_p0)
}
  0x5e   :  { %s1530_s2 = scalar_lea.vmem %s64_s13, 128  ;;  %p1535_p2 = scmp.lt.s32.totalorder %s64_s13, %s64_s13 }
  0x5f   :  { %p1531_p1 = scmp.ne.s32.totalorder %s64_s13, %s1530_s2  ;;  %p1536_p3 = scmp.lt.s32.totalorder %s1530_s2, %s1530_s2 }
  0x61   :  { %p1537_p4 = por %p1536_p3, %p1535_p2 }
  0x63   :  { %p1538_p5 = pnand %p1537_p4, %p1531_p1 }
  0x65   :  { %1541 = shalt.err (!%p1538_p5)
}
  0x66   :  { %66 = dma.hbm_to_vmem [thread:$0]  %s1789_s4, 128, %s64_s13, [#allocation9]  }
  0x67   :  { %s1542_s25 = scalar_lea.hbm %s1791_s6, 16 }
  0x68   :  { %p1543_p6 = scmp.ne.s32.totalorder %s1791_s6, %s1542_s25  ;;  %p1546_p7 = scmp.lt.u32.totalorder %s1542_s25, %s1791_s6 }
  0x6a   :  { %p1548_p8 = pnand %p1546_p7, %p1543_p6 }
  0x6c   :  { %1551 = shalt.err (!%p1548_p8)
}
  0x6d   :  { %s1552_s8 = scalar_lea.vmem %s86_s15, 16  ;;  %s1556_s9 = scalar_lea.vmem %s86_s15, 32 }
  0x6e   :  { %p1553_p9 = scmp.ne.s32.totalorder %s86_s15, %s1552_s8  ;;  %p1557_p10 = scmp.lt.s32.totalorder %s86_s15, %s86_s15 }
  0x6f   :  { %p1558_p11 = scmp.lt.s32.totalorder %s1556_s9, %s1552_s8 }
  0x71   :  { %p1559_p12 = por %p1558_p11, %p1557_p10 }
  0x73   :  { %p1560_p13 = pnand %p1559_p12, %p1553_p9 }
  0x75   :  { %1563 = shalt.err (!%p1560_p13)
}
  0x76   :  { %88 = dma.hbm_to_vmem [thread:$0]  %s1791_s6, 16, %s86_s15, [#allocation12]  }
  0x77   :  { %1586 = dma.done.wait [#allocation3], 32  }
  0x78   :  { %1587 = vsyncadd [#allocation3], 4294967264 }
  0x79   :  { %1588 = dma.done.wait [#allocation6], 80  }
  0x7a   :  { %1589 = vsyncadd [#allocation6], 4294967216 }
  0x7b   :  { %1590 = dma.done.wait [#allocation9], 384  }
  0x7c   :  { %1591 = vsyncadd [#allocation9], 4294966912 }
  0x7d   :  { %1592 = dma.done.wait [#allocation12], 8208  }
  0x7e   :  { %1593 = vsyncadd [#allocation12], 4294959088  ;;  %v1605_v0 = vmov 0.0   ;;  %vm1606_vm0 = vmmov 0   ;;  %vm125_vm1 = vcmask 1043456   ;;  %vm121_vm2 = vcmask 64512  }
  0x7f   :  { %1324 = vmatprep.subr.bf16.mxu0 %v1605_v0  ;;  %1326 = vmatprep.mubr.msk.bf16.mxu0 %vm1606_vm0, %v1605_v0  ;;  %v112_v1 = vld [vmem:[#allocation5] sm:$0xf]  ;;  %v111_v2 = vld [vmem:[#allocation2] sm:$0x3]  ;;  %v175_v5 = vlaneseq  ;;  %v1607_v6 = vmov 1983009808  }
  0x80   :  { %v127_v3 = vsel %vm125_vm1, %v112_v1, 0  ;;  %v114_v4 = vpack.c.bf16 %v111_v2, %v111_v2  ;;  %v219_v7 = vunpack.c.l.s4 %v1607_v6  ;;  %v170_v10 = vld [vmem:[#allocation8] sm:$0xff]  ;;  %vm255_vm3 = vcmask 1041408   ;;  %v171_v19 = vld [vmem:[#allocation8 + $0x8] sm:$0xff]  ;;  %v1159_v28 = vld [vmem:[#allocation7] ss:$0 sm:$0xff] }
  0x81   :  { %1325 = vmatpush3.bf16.msra.mxu0 %v127_v3  ;;  %v1734_v8 = vshrl.u32 %v175_v5, 7  ;;  %v217_v11 = vcombine.high %v170_v10, %v170_v10  ;;  %v234_v20 = vcombine.high %v171_v19, %v171_v19  ;;  %v1608_v21 = vmov 0   ;;  %v1346_v36 = vld [vmem:[#allocation11 + $0x40] sm:$0xff]   ;;  %v1350_v40 = vld [vmem:[#allocation11 + $0x48] sm:$0xff]   ;;  %v1354_v44 = vld [vmem:[#allocation11 + $0x50] sm:$0xff]   ;;  %s1609_s6 = smov [#allocation14]  }
  0x82   :  { %v220_v9 = vunpack.c.0.s8 %v219_v7  ;;  %312 = vmatprep.mubr.bf16.mxu1 %v1608_v21  ;;  %vm251_vm4 = vcmask 31744   ;;  %v1347_v37 = vld [vmem:[#allocation11 + $0xc0] sm:$0xff]   ;;  %v1351_v41 = vld [vmem:[#allocation11 + $0xc8] sm:$0xff]   ;;  %v1355_v45 = vld [vmem:[#allocation11 + $0xd0] sm:$0xff]   ;;  %s1147_s11 = sshll.u32 %s1609_s6, 4  ;;  %vm1139_vm5 = vcmask 58368   ;;  %s1148_s11 = int_to_ptr.vmem [resolvable:$true] %s1147_s11 }
  0x83   :  { %v1348_v38 = vld [vmem:[#allocation11] sm:$0xff]   ;;  %v1352_v42 = vld [vmem:[#allocation11 + $0x8] sm:$0xff]   ;;  %v1356_v46 = vld [vmem:[#allocation11 + $0x10] sm:$0xff]   ;;  %v177_v6 = vsub.s32 0, %v1734_v8  ;;  %v185_v7 = vsub.s32 2, %v1734_v8  ;;  %s1564_s3 = scalar_lea.vmem %s1148_s11, 32  ;;  %p1569_p1 = scmp.lt.s32.totalorder %s1148_s11, %s1148_s11 }
  0x84   :  { %1327 = vmatmul.mubr.msk.bf16.vlgmr.msra.gmra.mrb[0].mxu0 %vm121_vm2, %v114_v4  ;;  %v223_v12 = vsub.s32 %v220_v9, %v1734_v8  ;;  %v1349_v39 = vld [vmem:[#allocation11 + $0x80] sm:$0xff]   ;;  %v1353_v43 = vld [vmem:[#allocation11 + $0x88] sm:$0xff]   ;;  %v1357_v47 = vld [vmem:[#allocation11 + $0x90] sm:$0xff]   ;;  %p1565_p0 = scmp.ne.s32.totalorder %s1148_s11, %s1564_s3  ;;  %p1570_p2 = scmp.lt.s32.totalorder %s1564_s3, %s1564_s3 }
  0x85   :  { %353 = vmatprep.mubr.bf16.mxu0 %v1608_v21  ;;  %v1358_v48 = vld [vmem:[#allocation11 + $0x58] sm:$0xff]   ;;  %v1362_v52 = vld [vmem:[#allocation11 + $0x60] sm:$0xff]   ;;  %v1366_v56 = vld [vmem:[#allocation11 + $0x68] sm:$0xff]  }
  0x86   :  { %v231_v13 = vrot.slane %v217_v11, %v223_v12  ;;  %v224_v14 = vrot.slane %v170_v10, %v223_v12  ;;  %v241_v22 = vrot.slane %v171_v19, %v223_v12  ;;  %v248_v23 = vrot.slane %v234_v20, %v223_v12  ;;  %v1359_v49 = vld [vmem:[#allocation11 + $0xd8] sm:$0xff]   ;;  %v1363_v53 = vld [vmem:[#allocation11 + $0xe0] sm:$0xff]   ;;  %v1367_v57 = vld [vmem:[#allocation11 + $0xe8] sm:$0xff]   ;;  %p1571_p3 = por %p1570_p2, %p1569_p1 }
  0x87   :  { %v1360_v50 = vld [vmem:[#allocation11 + $0x18] sm:$0xff]   ;;  %v1364_v54 = vld [vmem:[#allocation11 + $0x20] sm:$0xff]   ;;  %v1368_v58 = vld [vmem:[#allocation11 + $0x28] sm:$0xff]   ;;  %v181_v10 = vsub.s32 1, %v1734_v8  ;;  %v189_v11 = vsub.s32 3, %v1734_v8 }
  0x88   :  { %v233_v15 = vcombine.high %v231_v13, %v231_v13  ;;  %v232_v16 = vcombine.high %v224_v14, %v224_v14  ;;  %v263_v17 = vsel %vm255_vm3, %v231_v13, 0  ;;  %v257_v18 = vsel %vm255_vm3, %v224_v14, 0  ;;  %v1361_v51 = vld [vmem:[#allocation11 + $0x98] sm:$0xff]   ;;  %v1365_v55 = vld [vmem:[#allocation11 + $0xa0] sm:$0xff]   ;;  %v1369_v59 = vld [vmem:[#allocation11 + $0xa8] sm:$0xff]   ;;  %p1572_p4 = pnand %p1571_p3, %p1565_p0 }
  0x89   :  { %v249_v24 = vcombine.high %v241_v22, %v241_v22  ;;  %v250_v25 = vcombine.high %v248_v23, %v248_v23  ;;  %v269_v26 = vsel %vm255_vm3, %v241_v22, 0  ;;  %v275_v27 = vsel %vm255_vm3, %v248_v23, 0  ;;  %v1370_v60 = vld [vmem:[#allocation11 + $0x70] sm:$0xff]   ;;  %v1374_v0 = vld [vmem:[#allocation11 + $0x78] sm:$0xff]   ;;  %v1378_v4 = vld [vmem:[#allocation11 + $0x140] sm:$0xff]  }
  0x8a   :  { %1163 = vmatprep.subr.msk.bf16.mxu0 %vm255_vm3, %v233_v15  ;;  %1161 = vmatprep.subr.msk.bf16.mxu1 %vm255_vm3, %v232_v16  ;;  %v1371_v61 = vld [vmem:[#allocation11 + $0xf0] sm:$0xff]   ;;  %v1375_v1 = vld [vmem:[#allocation11 + $0xf8] sm:$0xff]   ;;  %v1379_v5 = vld [vmem:[#allocation11 + $0x1c0] sm:$0xff]  }
  0x8b   :  { %322 = vmatpush1.bf16.msra.mxu0 %v263_v17  ;;  %281 = vmatpush1.bf16.msra.mxu1 %v257_v18  ;;  %v1372_v62 = vld [vmem:[#allocation11 + $0x30] sm:$0xff]   ;;  %v1376_v2 = vld [vmem:[#allocation11 + $0x38] sm:$0xff]  }
  0x8c   :  { %1165 = vmatprep.subr.msk.bf16.mxu1 %vm255_vm3, %v249_v24  ;;  %1167 = vmatprep.subr.msk.bf16.mxu0 %vm255_vm3, %v250_v25  ;;  %v1373_v63 = vld [vmem:[#allocation11 + $0xb0] sm:$0xff]   ;;  %v1377_v3 = vld [vmem:[#allocation11 + $0xb8] sm:$0xff]  }
  0x8d   :  { %v1751_v9 = vld [vmem:[#allocation10] sm:$0xff] }
  0x8e   :  { %v178_v12 = vrot.slane %v1751_v9, %v177_v6  ;;  %v186_v13 = vrot.slane %v1751_v9, %v185_v7  ;;  %v182_v14 = vrot.slane %v1751_v9, %v181_v10  ;;  %v190_v15 = vrot.slane %v1751_v9, %v189_v11  ;;  %v1396_v6 = vld [vmem:[#allocation11 + $0x120] sm:$0xff]  }
  0x8f   :  { %v1397_v7 = vld [vmem:[#allocation11 + $0x1a0] sm:$0xff]   ;;  %v193_v10 = vsub.s32 4, %v1734_v8  ;;  %v201_v11 = vsub.s32 6, %v1734_v8 }
 0x157   :  { %v163_v29 = vpop.f32.mrb[0].mxu0 }
 0x158   :  { %v164_v30 = vadd.f32 %v1159_v28, %v163_v29  ;;  %v1328_v31 = vpop.f32.mrb[1].mxu0 }
 0x159   :  { %v166_v32 = vpop.f32.mrb[2].mxu0 }
 0x15a   :  { %v169_v33 = vmax.f32 %v164_v30, 0.0  ;;  %v1329_v34 = vpop.f32.mrb[3].mxu0 }
 0x15c   :  { %v173_v35 = vpack.c.bf16 %v169_v33, %v169_v33 }
 0x15e   :  { %1162 = vmatmul.mubr.msk.bf16.vlgmr.msra.gmra.mrb[0].mxu1 %vm251_vm4, %v173_v35  ;;  %1164 = vmatmul.mubr.msk.bf16.vlgmr.msra.gmra.mrb[4].mxu0 %vm251_vm4, %v173_v35 }
 0x15f   :  { %363 = vmatpush1.bf16.msra.mxu1 %v269_v26  ;;  %404 = vmatpush1.bf16.msra.mxu0 %v275_v27  ;;  %v197_v26 = vsub.s32 5, %v1734_v8  ;;  %v205_v27 = vsub.s32 7, %v1734_v8  ;;  %v1405_v8 = vld [vmem:[#allocation11 + $0x1b0] sm:$0xff]  }
 0x160   :  { %394 = vmatprep.mubr.bf16.mxu1 %v1608_v21  ;;  %435 = vmatprep.mubr.bf16.mxu0 %v1608_v21 }
 0x161   :  { %1236 = vmatprep.subr.bf16.mxu1 %v1346_v36  ;;  %1258 = vmatprep.subr.bf16.mxu0 %v1347_v37  ;;  %v198_v36 = vrot.slane %v1751_v9, %v197_v26  ;;  %v206_v37 = vrot.slane %v1751_v9, %v205_v27 }
 0x166   :  { %1166 = vmatmul.mubr.msk.bf16.vlgmr.msra.gmra.mrb[4].mxu1 %vm251_vm4, %v173_v35  ;;  %1168 = vmatmul.mubr.msk.bf16.vlgmr.msra.gmra.mrb[8].mxu0 %vm251_vm4, %v173_v35 }
 0x167   :  { %1237 = vmatpush3.bf16.msra.mxu1 %v1348_v38  ;;  %1259 = vmatpush3.bf16.msra.mxu0 %v1349_v39  ;;  %v1380_v38 = vld [vmem:[#allocation11 + $0x100] sm:$0xff]  }
 0x168   :  { %1238 = vmatprep.subr.bf16.mxu1 %v1350_v40  ;;  %1260 = vmatprep.subr.bf16.mxu0 %v1351_v41  ;;  %v1381_v39 = vld [vmem:[#allocation11 + $0x180] sm:$0xff]  }
 0x16b   :  { %1239 = vmatpush3.bf16.msra.mxu1 %v1352_v42  ;;  %1261 = vmatpush3.bf16.msra.mxu0 %v1353_v43  ;;  %v1382_v42 = vld [vmem:[#allocation11 + $0x148] sm:$0xff]  }
 0x16c   :  { %1240 = vmatprep.subr.bf16.mxu1 %v1354_v44  ;;  %1262 = vmatprep.subr.bf16.mxu0 %v1355_v45  ;;  %v1383_v43 = vld [vmem:[#allocation11 + $0x1c8] sm:$0xff]  }
 0x16f   :  { %1241 = vmatpush3.bf16.msra.mxu1 %v1356_v46  ;;  %1263 = vmatpush3.bf16.msra.mxu0 %v1357_v47 }
 0x170   :  { %1242 = vmatprep.subr.bf16.mxu1 %v1358_v48  ;;  %1264 = vmatprep.subr.bf16.mxu0 %v1359_v49 }
 0x173   :  { %1243 = vmatpush3.bf16.msra.mxu1 %v1360_v50  ;;  %1265 = vmatpush3.bf16.msra.mxu0 %v1361_v51 }
 0x174   :  { %1244 = vmatprep.subr.bf16.mxu1 %v1362_v52  ;;  %1266 = vmatprep.subr.bf16.mxu0 %v1363_v53  ;;  %v1384_v52 = vld [vmem:[#allocation11 + $0x108] sm:$0xff]  }
 0x175   :  { %v1385_v53 = vld [vmem:[#allocation11 + $0x188] sm:$0xff]  }
 0x177   :  { %1245 = vmatpush3.bf16.msra.mxu1 %v1364_v54  ;;  %1267 = vmatpush3.bf16.msra.mxu0 %v1365_v55 }
 0x178   :  { %1246 = vmatprep.subr.bf16.mxu1 %v1366_v56  ;;  %1268 = vmatprep.subr.bf16.mxu0 %v1367_v57  ;;  %v1386_v56 = vld [vmem:[#allocation11 + $0x150] sm:$0xff]  }
 0x179   :  { %v1387_v57 = vld [vmem:[#allocation11 + $0x1d0] sm:$0xff]  }
 0x17b   :  { %1247 = vmatpush3.bf16.msra.mxu1 %v1368_v58  ;;  %1269 = vmatpush3.bf16.msra.mxu0 %v1369_v59 }
 0x17c   :  { %1248 = vmatprep.subr.bf16.mxu1 %v1370_v60  ;;  %1270 = vmatprep.subr.bf16.mxu0 %v1371_v61 }
 0x17f   :  { %1249 = vmatpush3.bf16.msra.mxu1 %v1372_v62  ;;  %1271 = vmatpush3.bf16.msra.mxu0 %v1373_v63  ;;  %v1388_v62 = vld [vmem:[#allocation11 + $0x110] sm:$0xff]  }
 0x180   :  { %1250 = vmatprep.subr.bf16.mxu1 %v1374_v0  ;;  %1272 = vmatprep.subr.bf16.mxu0 %v1375_v1  ;;  %v1389_v63 = vld [vmem:[#allocation11 + $0x190] sm:$0xff]   ;;  %v1390_v0 = vld [vmem:[#allocation11 + $0x158] sm:$0xff]  }
 0x181   :  { %v1391_v1 = vld [vmem:[#allocation11 + $0x1d8] sm:$0xff]  }
 0x183   :  { %1251 = vmatpush3.bf16.msra.mxu1 %v1376_v2  ;;  %1273 = vmatpush3.bf16.msra.mxu0 %v1377_v3  ;;  %v1392_v2 = vld [vmem:[#allocation11 + $0x118] sm:$0xff]  }
 0x184   :  { %1280 = vmatprep.subr.bf16.mxu1 %v1378_v4  ;;  %1302 = vmatprep.subr.bf16.mxu0 %v1379_v5  ;;  %v1393_v3 = vld [vmem:[#allocation11 + $0x198] sm:$0xff]   ;;  %v1394_v4 = vld [vmem:[#allocation11 + $0x160] sm:$0xff]  }
 0x185   :  { %v1395_v5 = vld [vmem:[#allocation11 + $0x1e0] sm:$0xff]  }
 0x231   :  { %v314_v16 = vpop.f32.mrb[0].mxu1  ;;  %v355_v17 = vpop.f32.mrb[4].mxu0 }
 0x232   :  { %v315_v18 = vadd.f32 %v314_v16, %v178_v12  ;;  %v356_v19 = vadd.f32 %v355_v17, %v186_v13  ;;  %v316_v20 = vpop.f32.mrb[1].mxu1  ;;  %v357_v21 = vpop.f32.mrb[5].mxu0  ;;  %v1398_v12 = vld [vmem:[#allocation11 + $0x168] sm:$0xff]   ;;  %v194_v16 = vrot.slane %v1751_v9, %v193_v10  ;;  %v202_v17 = vrot.slane %v1751_v9, %v201_v11  ;;  %v1409_v9 = vld [vmem:[#allocation11 + $0x1b8] sm:$0xff]  }
 0x233   :  { %v317_v22 = vadd.f32 %v316_v20, %v182_v14  ;;  %v358_v23 = vadd.f32 %v357_v21, %v190_v15  ;;  %v318_v24 = vpop.f32.mrb[2].mxu1  ;;  %v359_v25 = vpop.f32.mrb[6].mxu0  ;;  %v1399_v13 = vld [vmem:[#allocation11 + $0x1e8] sm:$0xff]   ;;  %v1404_v20 = vld [vmem:[#allocation11 + $0x130] sm:$0xff]  }
 0x234   :  { %v444_v28 = vmax.f32 %v315_v18, 0.0  ;;  %v446_v29 = vmax.f32 %v356_v19, 0.0  ;;  %v319_v30 = vpop.f32.mrb[3].mxu1  ;;  %v360_v31 = vpop.f32.mrb[7].mxu0  ;;  %v1400_v14 = vld [vmem:[#allocation11 + $0x128] sm:$0xff]   ;;  %v1402_v18 = vld [vmem:[#allocation11 + $0x170] sm:$0xff]  }
 0x235   :  { %v445_v32 = vmax.f32 %v317_v22, 0.0  ;;  %v447_v33 = vmax.f32 %v358_v23, 0.0  ;;  %v1401_v15 = vld [vmem:[#allocation11 + $0x1a8] sm:$0xff]   ;;  %v1403_v19 = vld [vmem:[#allocation11 + $0x1f0] sm:$0xff]   ;;  %v1406_v23 = vld [vmem:[#allocation11 + $0x178] sm:$0xff]  }
 0x236   :  { %v581_v40 = vpack.c.bf16 %v444_v28, %v444_v28  ;;  %v583_v41 = vpack.c.bf16 %v446_v29, %v446_v29  ;;  %v1407_v24 = vld [vmem:[#allocation11 + $0x1f8] sm:$0xff]  }
 0x237   :  { %v582_v34 = vpack.c.bf16 %v445_v32, %v445_v32  ;;  %v584_v35 = vpack.c.bf16 %v447_v33, %v447_v33  ;;  %v1408_v25 = vld [vmem:[#allocation11 + $0x138] sm:$0xff]   ;;  %v1169_v32 = vld [vmem:[#allocation13] ss:$0 sm:$0xff] }
 0x239   :  { %v1763_v44 = vpop.f32.mrb[4].mxu1  ;;  %v1765_v45 = vpop.f32.mrb[8].mxu0  ;;  %1011 = vmatprep.mubr.bf16.mxu1 %v582_v34  ;;  %1051 = vmatprep.mubr.bf16.mxu0 %v584_v35 }
 0x23a   :  { %v398_v46 = vpop.f32.mrb[5].mxu1  ;;  %v439_v47 = vpop.f32.mrb[9].mxu0  ;;  %1012 = vmatmul.mubr.bf16.vlgmr.msra.gmra.mrb[8].mxu1 %v581_v40  ;;  %1052 = vmatmul.mubr.bf16.vlgmr.msra.gmra.mrb[12].mxu0 %v583_v41  ;;  %v397_v21 = vadd.f32 %v1763_v44, %v194_v16  ;;  %v438_v22 = vadd.f32 %v1765_v45, %v202_v17 }
 0x23b   :  { %v399_v48 = vadd.f32 %v398_v46, %v198_v36  ;;  %v440_v49 = vadd.f32 %v439_v47, %v206_v37  ;;  %1281 = vmatpush3.bf16.msra.mxu1 %v1380_v38  ;;  %1303 = vmatpush3.bf16.msra.mxu0 %v1381_v39  ;;  %v400_v50 = vpop.f32.mrb[6].mxu1  ;;  %v441_v51 = vpop.f32.mrb[10].mxu0 }
 0x23c   :  { %v401_v54 = vpop.f32.mrb[7].mxu1  ;;  %v442_v55 = vpop.f32.mrb[11].mxu0  ;;  %1282 = vmatprep.subr.bf16.mxu1 %v1382_v42  ;;  %1304 = vmatprep.subr.bf16.mxu0 %v1383_v43  ;;  %v448_v26 = vmax.f32 %v397_v21, 0.0  ;;  %v450_v27 = vmax.f32 %v438_v22, 0.0 }
 0x23d   :  { %v449_v58 = vmax.f32 %v399_v48, 0.0  ;;  %v451_v59 = vmax.f32 %v440_v49, 0.0 }
 0x23e   :  { %v585_v28 = vpack.c.bf16 %v448_v26, %v448_v26  ;;  %v587_v29 = vpack.c.bf16 %v450_v27, %v450_v27 }
 0x23f   :  { %v586_v60 = vpack.c.bf16 %v449_v58, %v449_v58  ;;  %v588_v61 = vpack.c.bf16 %v451_v59, %v451_v59  ;;  %1283 = vmatpush3.bf16.msra.mxu1 %v1384_v52  ;;  %1305 = vmatpush3.bf16.msra.mxu0 %v1385_v53 }
 0x240   :  { %1284 = vmatprep.subr.bf16.mxu1 %v1386_v56  ;;  %1306 = vmatprep.subr.bf16.mxu0 %v1387_v57 }
 0x241   :  { %1091 = vmatprep.mubr.bf16.mxu1 %v586_v60  ;;  %1131 = vmatprep.mubr.bf16.mxu0 %v588_v61 }
 0x243   :  { %1285 = vmatpush3.bf16.msra.mxu1 %v1388_v62  ;;  %1307 = vmatpush3.bf16.msra.mxu0 %v1389_v63 }
 0x244   :  { %1286 = vmatprep.subr.bf16.mxu1 %v1390_v0  ;;  %1308 = vmatprep.subr.bf16.mxu0 %v1391_v1 }
 0x247   :  { %1287 = vmatpush3.bf16.msra.mxu1 %v1392_v2  ;;  %1309 = vmatpush3.bf16.msra.mxu0 %v1393_v3 }
 0x248   :  { %1288 = vmatprep.subr.bf16.mxu1 %v1394_v4  ;;  %1310 = vmatprep.subr.bf16.mxu0 %v1395_v5 }
 0x24b   :  { %1289 = vmatpush3.bf16.msra.mxu1 %v1396_v6  ;;  %1311 = vmatpush3.bf16.msra.mxu0 %v1397_v7 }
 0x24c   :  { %1290 = vmatprep.subr.bf16.mxu1 %v1398_v12  ;;  %1312 = vmatprep.subr.bf16.mxu0 %v1399_v13 }
 0x24f   :  { %1291 = vmatpush3.bf16.msra.mxu1 %v1400_v14  ;;  %1313 = vmatpush3.bf16.msra.mxu0 %v1401_v15 }
 0x250   :  { %1292 = vmatprep.subr.bf16.mxu1 %v1402_v18  ;;  %1314 = vmatprep.subr.bf16.mxu0 %v1403_v19 }
 0x253   :  { %1293 = vmatpush3.bf16.msra.mxu1 %v1404_v20  ;;  %1315 = vmatpush3.bf16.msra.mxu0 %v1405_v8 }
 0x254   :  { %1294 = vmatprep.subr.bf16.mxu1 %v1406_v23  ;;  %1316 = vmatprep.subr.bf16.mxu0 %v1407_v24 }
 0x257   :  { %1295 = vmatpush3.bf16.msra.mxu1 %v1408_v25  ;;  %1317 = vmatpush3.bf16.msra.mxu0 %v1409_v9 }
 0x25a   :  { %1092 = vmatmul.mubr.bf16.vlgmr.msra.gmra.mrb[12].mxu1 %v585_v28  ;;  %1132 = vmatmul.mubr.bf16.vlgmr.msra.gmra.mrb[16].mxu0 %v587_v29 }
 0x30d   :  { %v1252_v30 = vpop.f32.mrb[8].mxu1  ;;  %v1274_v31 = vpop.f32.mrb[12].mxu0 }
 0x30e   :  { %v1253_v33 = vpop.f32.mrb[9].mxu1  ;;  %v1275_v34 = vpop.f32.mrb[13].mxu0 }
 0x30f   :  { %v1254_v35 = vadd.f32 %v1253_v33, %v1252_v30  ;;  %v1276_v36 = vadd.f32 %v1275_v34, %v1274_v31  ;;  %v1255_v37 = vpop.f32.mrb[10].mxu1  ;;  %v1277_v38 = vpop.f32.mrb[14].mxu0 }
 0x310   :  { %v1256_v39 = vpop.f32.mrb[11].mxu1  ;;  %v1278_v40 = vpop.f32.mrb[15].mxu0 }
 0x311   :  { %v1014_v41 = vadd.f32 %v1254_v35, %v1169_v32 }
 0x313   :  { %v1054_v42 = vadd.f32 %v1276_v36, %v1014_v41 }
 0x32d   :  { %v1296_v43 = vpop.f32.mrb[12].mxu1  ;;  %v1318_v44 = vpop.f32.mrb[16].mxu0 }
 0x32e   :  { %v1297_v45 = vpop.f32.mrb[13].mxu1  ;;  %v1319_v46 = vpop.f32.mrb[17].mxu0 }
 0x32f   :  { %v1298_v47 = vadd.f32 %v1297_v45, %v1296_v43  ;;  %v1320_v48 = vadd.f32 %v1319_v46, %v1318_v44  ;;  %v1299_v49 = vpop.f32.mrb[14].mxu1  ;;  %v1321_v50 = vpop.f32.mrb[18].mxu0 }
 0x330   :  { %v1300_v51 = vpop.f32.mrb[15].mxu1  ;;  %v1322_v52 = vpop.f32.mrb[19].mxu0 }
 0x331   :  { %v1094_v53 = vadd.f32 %v1298_v47, %v1054_v42 }
 0x333   :  { %v1134_v54 = vadd.f32 %v1320_v48, %v1094_v53 }
 0x335   :  { %1140 = vst.msk [vmem:[#allocation14] sm:$0x3] %vm1139_vm5, %v1134_v54 }
 0x336   :  { %1575 = shalt.err (!%p1572_p4)
}
 0x337   :  { %s1576_s12 = scalar_lea.hbm %s1792_s7, 32 }
 0x338   :  { %p1577_p5 = scmp.ne.s32.totalorder %s1792_s7, %s1576_s12  ;;  %p1580_p6 = scmp.lt.u32.totalorder %s1576_s12, %s1792_s7 }
 0x33a   :  { %p1582_p7 = pnand %p1580_p6, %p1577_p5 }
 0x33c   :  { %1585 = shalt.err (!%p1582_p7)
}
 0x33d   :  { %1150 = dma.vmem_to_hbm [thread:$0]  %s1148_s11, 32, %s1792_s7, [#allocation4]  }
 0x33e   :  { %1594 = dma.done.wait [#allocation4], 32  }
 0x33f   :  { %1595 = vsyncadd [#allocation4], 4294967264 }
 0x340   :  { %1154 = vsyncpa [#allocation3], 1 }
 0x341   :  { %1155 = vsyncpa [#allocation6], 1 }
 0x342   :  { %1156 = vsyncpa [#allocation9], 1 }
 0x343   :  { %1157 = vsyncpa [#allocation12], 1 }
 0x344   :  { %1158 = vsyncpa [#allocation4], 1 }

</bundles_post_ra>
